<compile_context>
chip_gen: v7x
topology: tpu7x:2x2x1
jax: 0.10.0
libtpu: 0.0.40
codegen_flags: <defaults>
</compile_context>

<pallas_src>
import math

import jax
import jax.numpy as jnp
from jax.experimental import pallas as pl
from jax.experimental.pallas import tpu as pltpu  # noqa: F401  (TPU backend)

# --- tiny ViT config (same forward semantics as torchvision ViT, small dims) ---
B = 2            # batch
C = 3            # input channels
IMG = 16         # image side
PATCH = 8        # patch side
D = 32           # hidden dim
HEADS = 4
DH = D // HEADS
MLP = 64         # mlp dim
LAYERS = 2
NUM_CLASSES = 10
OUT_PAD = 128    # lane-dense logits slab; host keeps first NUM_CLASSES lanes
GRID_HW = IMG // PATCH
P = GRID_HW * GRID_HW          # number of patches
S = P + 1                      # tokens (class token + patches)
BS = B * S                     # total token rows across the batch
CPP = C * PATCH * PATCH        # im2col row width
EPS = 1e-6
NEG_BIG = -1e30                # finite "minus infinity" for the attention mask


# ----------------------------- in-kernel helpers -----------------------------
def _layernorm(x, g, b):
    mu = jnp.mean(x, axis=-1, keepdims=True)
    var = jnp.mean(jnp.square(x - mu), axis=-1, keepdims=True)
    return (x - mu) * jax.lax.rsqrt(var + EPS) * g + b


def _erf(x):
    # Abramowitz & Stegun 7.1.26 rational approximation, |err| < 1.5e-7
    # (exact at f32 precision) -- matches torchvision's exact (erf) nn.GELU
    # using only exp / mul / add / select, which all lower cleanly in Mosaic.
    a1, a2, a3, a4, a5 = (0.254829592, -0.284496736, 1.421413741,
                          -1.453152027, 1.061405429)
    p = 0.3275911
    ax = jnp.abs(x)
    t = 1.0 / (1.0 + p * ax)           # exact divide: keep erf accuracy
    poly = ((((a5 * t + a4) * t + a3) * t + a2) * t + a1) * t
    y = 1.0 - poly * jnp.exp(-ax * ax)
    return jnp.where(x < 0.0, -y, y)


def _gelu_exact(x):
    return 0.5 * x * (1.0 + _erf(x * 0.7071067811865476))


# ----------------------------- fused forward kernel --------------------------
def _vit_kernel(patches_ref, mask_ref, convw_ref, tokbase_ref,
                ln1g_ref, ln1b_ref, wqkv_ref, bqkv_ref, wo_ref, bo_ref,
                ln2g_ref, ln2b_ref, w1_ref, b1_ref, w2_ref, b2_ref,
                lng_ref, lnb_ref, hw_ref, hb_ref, o_ref):
    # Patch embedding (Conv2d kernel=stride=patch as im2col matmul). The class
    # rows of `patches` are zero; `tokbase` already carries class_token,
    # positional embedding and the conv bias, so one matmul yields all tokens.
    x = jnp.dot(patches_ref[...], convw_ref[...],
                preferred_element_type=jnp.float32) + tokbase_ref[...]   # (BS, D)

    # Block-diagonal additive mask: 0 for same-image (query,key) pairs,
    # -1e30 across images. Loaded once, reused by every layer/head.
    mask = mask_ref[...]                                                  # (BS, BS)

    for l in range(LAYERS):                         # statically unrolled
        # --- pre-norm multi-head self-attention (batch fused via mask) ---
        h = _layernorm(x, ln1g_ref[l], ln1b_ref[l])
        qkv = jnp.dot(h, wqkv_ref[l],
                      preferred_element_type=jnp.float32) + bqkv_ref[l]   # (BS, 3D)
        head_outs = []
        for hd in range(HEADS):                     # static loop over heads
            # Q is pre-scaled by 1/sqrt(DH) via the folded W_qkv columns.
            q = qkv[:, hd * DH:(hd + 1) * DH]                      # (BS, DH)
            k = qkv[:, D + hd * DH:D + (hd + 1) * DH]              # (BS, DH)
            v = qkv[:, 2 * D + hd * DH:2 * D + (hd + 1) * DH]      # (BS, DH)
            s = jax.lax.dot_general(q, k, (((1,), (1,)), ((), ())),
                                    preferred_element_type=jnp.float32)   # (BS, BS)
            s = s + mask
            s = s - jnp.max(s, axis=-1, keepdims=True)
            e = jnp.exp(s)
            pr = e * pl.reciprocal(jnp.sum(e, axis=-1, keepdims=True),
                                   approx=True)
            head_outs.append(jnp.dot(pr, v,
                                     preferred_element_type=jnp.float32))  # (BS, DH)
        # lane-axis concat -> (BS, D), then ONE out-projection matmul
        attn = jnp.concatenate(head_outs, axis=-1)
        x = x + jnp.dot(attn, wo_ref[l],
                        preferred_element_type=jnp.float32) + bo_ref[l]

        # --- pre-norm MLP (exact GELU) ---
        h2 = _layernorm(x, ln2g_ref[l], ln2b_ref[l])
        m = jnp.dot(h2, w1_ref[l], preferred_element_type=jnp.float32) + b1_ref[l]
        m = _gelu_exact(m)
        x = x + jnp.dot(m, w2_ref[l], preferred_element_type=jnp.float32) + b2_ref[l]

    # Final LayerNorm + classification head, computed on every token row as one
    # lane-dense (BS, D) @ (D, 128) matmul; LN/head are per-row so the class
    # rows are identical to selecting the class token first. Host keeps rows
    # [::S] and lanes [:NUM_CLASSES].
    hN = _layernorm(x, lng_ref[...], lnb_ref[...])
    o_ref[...] = jnp.dot(hN, hw_ref[...],
                         preferred_element_type=jnp.float32) + hb_ref[...]


# ----------------------------- wrapper ---------------------------------------
def vit_forward(x, params):
    # _process_input: Conv2d(kernel=patch, stride=patch) == im2col + matmul.
    xp = x.reshape(B, C, GRID_HW, PATCH, GRID_HW, PATCH)
    xp = xp.transpose(0, 2, 4, 1, 3, 5).reshape(B, P, CPP)
    # Prepend an all-zero "patch" row per image for the class-token slot so the
    # full (BS, D) token tensor falls out of a single in-kernel matmul.
    patches = jnp.concatenate(
        [jnp.zeros((B, 1, CPP), jnp.float32), xp], axis=1).reshape(BS, CPP)

    # Static block-diagonal attention mask (0 intra-image, -1e30 cross-image).
    img_id = jnp.arange(BS, dtype=jnp.int32) // S
    mask = jnp.where(img_id[:, None] == img_id[None, :],
                     0.0, NEG_BIG).astype(jnp.float32)

    # Advisory cost estimate for XLA scheduling of the custom call.
    flops_per_layer = (2 * BS * D * 3 * D            # qkv
                       + 2 * 2 * BS * BS * D         # scores + P@V (all heads)
                       + 2 * BS * D * D              # out-projection
                       + 2 * 2 * BS * D * MLP)       # mlp fc1 + fc2
    flops = 2 * BS * CPP * D + LAYERS * flops_per_layer + 2 * BS * D * OUT_PAD
    transcendentals = LAYERS * (HEADS * BS * BS + BS * MLP)
    param_elems = sum(int(v.size) for v in params.values())
    bytes_accessed = 4 * (patches.size + mask.size + param_elems + BS * OUT_PAD)
    cost = pl.CostEstimate(flops=int(flops),
                           transcendentals=int(transcendentals),
                           bytes_accessed=int(bytes_accessed))

    out = pl.pallas_call(
        _vit_kernel,
        out_shape=jax.ShapeDtypeStruct((BS, OUT_PAD), jnp.float32),
        cost_estimate=cost,
    )(patches, mask, params["conv_w"], params["tokbase"],
      params["ln1g"], params["ln1b"], params["wqkv"], params["bqkv"],
      params["wo"], params["bo"], params["ln2g"], params["ln2b"],
      params["w1"], params["b1"], params["w2"], params["b2"],
      params["ln_g"], params["ln_b"], params["head_w"], params["head_b"])

    # class-token rows, un-padded logits
    return out[::S, :NUM_CLASSES]


# ------------------------- deterministic params -------------------------------
def init_params(key):
    ks = list(jax.random.split(key, 64))

    def nrm(shape):
        return (0.02 * jax.random.normal(ks.pop(), shape)).astype(jnp.float32)

    conv_w = nrm((CPP, D))                      # conv_proj as (in, out)
    conv_b = nrm((1, D))
    class_token = nrm((1, 1, D))
    pos_emb = nrm((1, S, D))

    # token base rows: class row = class_token + pos[0]; patch rows = pos[1:]
    # + conv bias (so the in-kernel patch matmul needs no separate bias add).
    cls_row = class_token.reshape(1, D) + pos_emb[0, 0:1, :]
    patch_rows = pos_emb[0, 1:, :] + conv_b
    tokbase = jnp.tile(jnp.concatenate([cls_row, patch_rows], axis=0), (B, 1))

    scale = 1.0 / math.sqrt(DH)
    q_scale = jnp.concatenate([jnp.full((1, D), scale, jnp.float32),
                               jnp.ones((1, 2 * D), jnp.float32)], axis=1)

    ln1g, ln1b, wqkv, bqkv = [], [], [], []
    wo, bo, ln2g, ln2b = [], [], [], []
    w1, b1, w2, b2 = [], [], [], []
    for _ in range(LAYERS):
        ln1g.append(jnp.ones((1, D), jnp.float32))
        ln1b.append(jnp.zeros((1, D), jnp.float32))
        # fold the 1/sqrt(DH) attention scale into the Q part of W_qkv / b_qkv
        # (torchvision in_proj_bias starts at zero; scale is applied so loading
        #  real nonzero Q biases later stays correct).
        wqkv.append(nrm((D, 3 * D)) * q_scale)
        bqkv.append(jnp.zeros((1, 3 * D), jnp.float32) * q_scale)
        wo.append(nrm((D, D)))
        bo.append(jnp.zeros((1, D), jnp.float32))
        ln2g.append(jnp.ones((1, D), jnp.float32))
        ln2b.append(jnp.zeros((1, D), jnp.float32))
        w1.append(nrm((D, MLP)))
        b1.append(jnp.zeros((1, MLP), jnp.float32))
        w2.append(nrm((MLP, D)))
        b2.append(jnp.zeros((1, D), jnp.float32))

    head_w = nrm((D, NUM_CLASSES))
    head_b = jnp.zeros((1, NUM_CLASSES), jnp.float32)
    # lane-pad the head to a 128-wide output slab (zero extra columns)
    head_w_pad = jnp.zeros((D, OUT_PAD), jnp.float32).at[:, :NUM_CLASSES].set(head_w)
    head_b_pad = jnp.zeros((1, OUT_PAD), jnp.float32).at[:, :NUM_CLASSES].set(head_b)

    stack = lambda xs: jnp.stack(xs, axis=0)
    return {
        "conv_w": conv_w,
        "tokbase": tokbase,
        "ln1g": stack(ln1g), "ln1b": stack(ln1b),
        "wqkv": stack(wqkv), "bqkv": stack(bqkv),
        "wo": stack(wo), "bo": stack(bo),
        "ln2g": stack(ln2g), "ln2b": stack(ln2b),
        "w1": stack(w1), "b1": stack(b1),
        "w2": stack(w2), "b2": stack(b2),
        "ln_g": jnp.ones((1, D), jnp.float32),
        "ln_b": jnp.zeros((1, D), jnp.float32),
        "head_w": head_w_pad, "head_b": head_b_pad,
    }


if __name__ == "__main__":
    key = jax.random.PRNGKey(0)
    kx, kp = jax.random.split(key)
    # NOTE: torchvision's Resize/Normalize transform is host-side preprocessing,
    # not part of module.forward; inputs here are already "normalized" tensors.
    x = jax.random.normal(kx, (B, C, IMG, IMG), dtype=jnp.float32)
    params = init_params(kp)

    fwd = jax.jit(lambda inp: vit_forward(inp, params))
    out = jax.block_until_ready(fwd(x))

    assert out.shape == (B, NUM_CLASSES), out.shape
    assert bool(jnp.all(jnp.isfinite(out)))
    print("KERNEL_OK")
</pallas_src>

<mosaic_0001>
module attributes {stable_mosaic.version = 11 : i64} {
  func.func @_vit_kernel(%arg0: memref<10x192xf32, #tpu.memory_space<vmem>>, %arg1: memref<10x10xf32, #tpu.memory_space<vmem>>, %arg2: memref<192x32xf32, #tpu.memory_space<vmem>>, %arg3: memref<10x32xf32, #tpu.memory_space<vmem>>, %arg4: memref<2x1x32xf32, #tpu.memory_space<vmem>>, %arg5: memref<2x1x32xf32, #tpu.memory_space<vmem>>, %arg6: memref<2x32x96xf32, #tpu.memory_space<vmem>>, %arg7: memref<2x1x96xf32, #tpu.memory_space<vmem>>, %arg8: memref<2x32x32xf32, #tpu.memory_space<vmem>>, %arg9: memref<2x1x32xf32, #tpu.memory_space<vmem>>, %arg10: memref<2x1x32xf32, #tpu.memory_space<vmem>>, %arg11: memref<2x1x32xf32, #tpu.memory_space<vmem>>, %arg12: memref<2x32x64xf32, #tpu.memory_space<vmem>>, %arg13: memref<2x1x64xf32, #tpu.memory_space<vmem>>, %arg14: memref<2x64x32xf32, #tpu.memory_space<vmem>>, %arg15: memref<2x1x32xf32, #tpu.memory_space<vmem>>, %arg16: memref<1x32xf32, #tpu.memory_space<vmem>>, %arg17: memref<1x32xf32, #tpu.memory_space<vmem>>, %arg18: memref<32x128xf32, #tpu.memory_space<vmem>>, %arg19: memref<1x128xf32, #tpu.memory_space<vmem>>, %arg20: memref<10x128xf32, #tpu.memory_space<vmem>>) attributes {dimension_semantics = [], scalar_prefetch = 0 : i64, scratch_operands = 0 : i64, tpu.core_type = #tpu.core_type<tc>} {
    %c0 = arith.constant 0 : index
    %c0_0 = arith.constant 0 : index
    %0 = vector.load %arg0[%c0, %c0_0] : memref<10x192xf32, #tpu.memory_space<vmem>>, vector<10x192xf32>
    %c0_1 = arith.constant 0 : index
    %c0_2 = arith.constant 0 : index
    %1 = vector.load %arg2[%c0_1, %c0_2] : memref<192x32xf32, #tpu.memory_space<vmem>>, vector<192x32xf32>
    %cst = arith.constant dense<0.000000e+00> : vector<10x32xf32>
    %2 = tpu.matmul %0, %1, %cst {dimension_numbers = #tpu.dot_dimension_numbers<[1], [0], [0], [1], [0, 0, 1, 1], [], []>} : vector<10x192xf32>, vector<192x32xf32>, vector<10x32xf32> -> vector<10x32xf32>
    %c0_3 = arith.constant 0 : index
    %c0_4 = arith.constant 0 : index
    %3 = vector.load %arg3[%c0_3, %c0_4] : memref<10x32xf32, #tpu.memory_space<vmem>>, vector<10x32xf32>
    %4 = arith.addf %2, %3 : vector<10x32xf32>
    %c0_5 = arith.constant 0 : index
    %c0_6 = arith.constant 0 : index
    %5 = vector.load %arg1[%c0_5, %c0_6] : memref<10x10xf32, #tpu.memory_space<vmem>>, vector<10x10xf32>
    %c0_7 = arith.constant 0 : index
    %c0_8 = arith.constant 0 : index
    %c0_9 = arith.constant 0 : index
    %6 = vector.load %arg4[%c0_7, %c0_8, %c0_9] : memref<2x1x32xf32, #tpu.memory_space<vmem>>, vector<1x1x32xf32>
    %7 = vector.shape_cast %6 : vector<1x1x32xf32> to vector<1x32xf32>
    %c0_10 = arith.constant 0 : index
    %c0_11 = arith.constant 0 : index
    %c0_12 = arith.constant 0 : index
    %8 = vector.load %arg5[%c0_10, %c0_11, %c0_12] : memref<2x1x32xf32, #tpu.memory_space<vmem>>, vector<1x1x32xf32>
    %9 = vector.shape_cast %8 : vector<1x1x32xf32> to vector<1x32xf32>
    %cst_13 = arith.constant dense<0.000000e+00> : vector<10xf32>
    %10 = vector.multi_reduction <add>, %4, %cst_13 [1] : vector<10x32xf32> to vector<10xf32>
    %11 = vector.shape_cast %10 : vector<10xf32> to vector<10x1xf32>
    %cst_14 = arith.constant 3.200000e+01 : f32
    %12 = vector.broadcast %cst_14 : f32 to vector<10x1xf32>
    %13 = arith.divf %11, %12 : vector<10x1xf32>
    %14 = vector.broadcast %13 : vector<10x1xf32> to vector<10x32xf32>
    %15 = arith.subf %4, %14 : vector<10x32xf32>
    %16 = arith.mulf %15, %15 : vector<10x32xf32>
    %cst_15 = arith.constant dense<0.000000e+00> : vector<10xf32>
    %17 = vector.multi_reduction <add>, %16, %cst_15 [1] : vector<10x32xf32> to vector<10xf32>
    %18 = vector.shape_cast %17 : vector<10xf32> to vector<10x1xf32>
    %cst_16 = arith.constant 3.200000e+01 : f32
    %19 = vector.broadcast %cst_16 : f32 to vector<10x1xf32>
    %20 = arith.divf %18, %19 : vector<10x1xf32>
    %21 = vector.broadcast %13 : vector<10x1xf32> to vector<10x32xf32>
    %22 = arith.subf %4, %21 : vector<10x32xf32>
    %cst_17 = arith.constant 9.99999997E-7 : f32
    %23 = vector.broadcast %cst_17 : f32 to vector<10x1xf32>
    %24 = arith.addf %20, %23 : vector<10x1xf32>
    %25 = math.rsqrt %24 : vector<10x1xf32>
    %26 = vector.broadcast %25 : vector<10x1xf32> to vector<10x32xf32>
    %27 = arith.mulf %22, %26 : vector<10x32xf32>
    %28 = vector.broadcast %7 : vector<1x32xf32> to vector<10x32xf32>
    %29 = arith.mulf %27, %28 : vector<10x32xf32>
    %30 = vector.broadcast %9 : vector<1x32xf32> to vector<10x32xf32>
    %31 = arith.addf %29, %30 : vector<10x32xf32>
    %c0_18 = arith.constant 0 : index
    %c0_19 = arith.constant 0 : index
    %c0_20 = arith.constant 0 : index
    %32 = vector.load %arg6[%c0_18, %c0_19, %c0_20] : memref<2x32x96xf32, #tpu.memory_space<vmem>>, vector<1x32x96xf32>
    %33 = vector.shape_cast %32 : vector<1x32x96xf32> to vector<32x96xf32>
    %cst_21 = arith.constant dense<0.000000e+00> : vector<10x96xf32>
    %34 = tpu.matmul %31, %33, %cst_21 {dimension_numbers = #tpu.dot_dimension_numbers<[1], [0], [0], [1], [0, 0, 1, 1], [], []>} : vector<10x32xf32>, vector<32x96xf32>, vector<10x96xf32> -> vector<10x96xf32>
    %c0_22 = arith.constant 0 : index
    %c0_23 = arith.constant 0 : index
    %c0_24 = arith.constant 0 : index
    %35 = vector.load %arg7[%c0_22, %c0_23, %c0_24] : memref<2x1x96xf32, #tpu.memory_space<vmem>>, vector<1x1x96xf32>
    %36 = vector.shape_cast %35 : vector<1x1x96xf32> to vector<1x96xf32>
    %37 = vector.broadcast %36 : vector<1x96xf32> to vector<10x96xf32>
    %38 = arith.addf %34, %37 : vector<10x96xf32>
    %39 = vector.extract_strided_slice %38 {offsets = [0, 0], sizes = [10, 8], strides = [1, 1]} : vector<10x96xf32> to vector<10x8xf32>
    %40 = vector.extract_strided_slice %38 {offsets = [0, 32], sizes = [10, 8], strides = [1, 1]} : vector<10x96xf32> to vector<10x8xf32>
    %41 = vector.extract_strided_slice %38 {offsets = [0, 64], sizes = [10, 8], strides = [1, 1]} : vector<10x96xf32> to vector<10x8xf32>
    %cst_25 = arith.constant dense<0.000000e+00> : vector<10x10xf32>
    %42 = tpu.matmul %39, %40, %cst_25 {dimension_numbers = #tpu.dot_dimension_numbers<[1], [1], [0], [0], [0, 0, 1, 0], [], []>} : vector<10x8xf32>, vector<10x8xf32>, vector<10x10xf32> -> vector<10x10xf32>
    %43 = arith.addf %42, %5 : vector<10x10xf32>
    %cst_26 = arith.constant dense<0xFF800000> : vector<10xf32>
    %44 = vector.multi_reduction <maximumf>, %43, %cst_26 [1] : vector<10x10xf32> to vector<10xf32>
    %45 = vector.shape_cast %44 : vector<10xf32> to vector<10x1xf32>
    %46 = vector.broadcast %45 : vector<10x1xf32> to vector<10x10xf32>
    %47 = arith.subf %43, %46 : vector<10x10xf32>
    %48 = math.exp %47 : vector<10x10xf32>
    %cst_27 = arith.constant dense<0.000000e+00> : vector<10xf32>
    %49 = vector.multi_reduction <add>, %48, %cst_27 [1] : vector<10x10xf32> to vector<10xf32>
    %50 = vector.shape_cast %49 : vector<10xf32> to vector<10x1xf32>
    %51 = tpu.reciprocal %50 {approx = true} : vector<10x1xf32> -> vector<10x1xf32>
    %52 = vector.broadcast %51 : vector<10x1xf32> to vector<10x10xf32>
    %53 = arith.mulf %48, %52 : vector<10x10xf32>
    %cst_28 = arith.constant dense<0.000000e+00> : vector<10x8xf32>
    %54 = tpu.matmul %53, %41, %cst_28 {dimension_numbers = #tpu.dot_dimension_numbers<[1], [0], [0], [1], [0, 0, 1, 1], [], []>} : vector<10x10xf32>, vector<10x8xf32>, vector<10x8xf32> -> vector<10x8xf32>
    %55 = vector.extract_strided_slice %38 {offsets = [0, 8], sizes = [10, 8], strides = [1, 1]} : vector<10x96xf32> to vector<10x8xf32>
    %56 = vector.extract_strided_slice %38 {offsets = [0, 40], sizes = [10, 8], strides = [1, 1]} : vector<10x96xf32> to vector<10x8xf32>
    %57 = vector.extract_strided_slice %38 {offsets = [0, 72], sizes = [10, 8], strides = [1, 1]} : vector<10x96xf32> to vector<10x8xf32>
    %cst_29 = arith.constant dense<0.000000e+00> : vector<10x10xf32>
    %58 = tpu.matmul %55, %56, %cst_29 {dimension_numbers = #tpu.dot_dimension_numbers<[1], [1], [0], [0], [0, 0, 1, 0], [], []>} : vector<10x8xf32>, vector<10x8xf32>, vector<10x10xf32> -> vector<10x10xf32>
    %59 = arith.addf %58, %5 : vector<10x10xf32>
    %cst_30 = arith.constant dense<0xFF800000> : vector<10xf32>
    %60 = vector.multi_reduction <maximumf>, %59, %cst_30 [1] : vector<10x10xf32> to vector<10xf32>
    %61 = vector.shape_cast %60 : vector<10xf32> to vector<10x1xf32>
    %62 = vector.broadcast %61 : vector<10x1xf32> to vector<10x10xf32>
    %63 = arith.subf %59, %62 : vector<10x10xf32>
    %64 = math.exp %63 : vector<10x10xf32>
    %cst_31 = arith.constant dense<0.000000e+00> : vector<10xf32>
    %65 = vector.multi_reduction <add>, %64, %cst_31 [1] : vector<10x10xf32> to vector<10xf32>
    %66 = vector.shape_cast %65 : vector<10xf32> to vector<10x1xf32>
    %67 = tpu.reciprocal %66 {approx = true} : vector<10x1xf32> -> vector<10x1xf32>
    %68 = vector.broadcast %67 : vector<10x1xf32> to vector<10x10xf32>
    %69 = arith.mulf %64, %68 : vector<10x10xf32>
    %cst_32 = arith.constant dense<0.000000e+00> : vector<10x8xf32>
    %70 = tpu.matmul %69, %57, %cst_32 {dimension_numbers = #tpu.dot_dimension_numbers<[1], [0], [0], [1], [0, 0, 1, 1], [], []>} : vector<10x10xf32>, vector<10x8xf32>, vector<10x8xf32> -> vector<10x8xf32>
    %71 = vector.extract_strided_slice %38 {offsets = [0, 16], sizes = [10, 8], strides = [1, 1]} : vector<10x96xf32> to vector<10x8xf32>
    %72 = vector.extract_strided_slice %38 {offsets = [0, 48], sizes = [10, 8], strides = [1, 1]} : vector<10x96xf32> to vector<10x8xf32>
    %73 = vector.extract_strided_slice %38 {offsets = [0, 80], sizes = [10, 8], strides = [1, 1]} : vector<10x96xf32> to vector<10x8xf32>
    %cst_33 = arith.constant dense<0.000000e+00> : vector<10x10xf32>
    %74 = tpu.matmul %71, %72, %cst_33 {dimension_numbers = #tpu.dot_dimension_numbers<[1], [1], [0], [0], [0, 0, 1, 0], [], []>} : vector<10x8xf32>, vector<10x8xf32>, vector<10x10xf32> -> vector<10x10xf32>
    %75 = arith.addf %74, %5 : vector<10x10xf32>
    %cst_34 = arith.constant dense<0xFF800000> : vector<10xf32>
    %76 = vector.multi_reduction <maximumf>, %75, %cst_34 [1] : vector<10x10xf32> to vector<10xf32>
    %77 = vector.shape_cast %76 : vector<10xf32> to vector<10x1xf32>
    %78 = vector.broadcast %77 : vector<10x1xf32> to vector<10x10xf32>
    %79 = arith.subf %75, %78 : vector<10x10xf32>
    %80 = math.exp %79 : vector<10x10xf32>
    %cst_35 = arith.constant dense<0.000000e+00> : vector<10xf32>
    %81 = vector.multi_reduction <add>, %80, %cst_35 [1] : vector<10x10xf32> to vector<10xf32>
    %82 = vector.shape_cast %81 : vector<10xf32> to vector<10x1xf32>
    %83 = tpu.reciprocal %82 {approx = true} : vector<10x1xf32> -> vector<10x1xf32>
    %84 = vector.broadcast %83 : vector<10x1xf32> to vector<10x10xf32>
    %85 = arith.mulf %80, %84 : vector<10x10xf32>
    %cst_36 = arith.constant dense<0.000000e+00> : vector<10x8xf32>
    %86 = tpu.matmul %85, %73, %cst_36 {dimension_numbers = #tpu.dot_dimension_numbers<[1], [0], [0], [1], [0, 0, 1, 1], [], []>} : vector<10x10xf32>, vector<10x8xf32>, vector<10x8xf32> -> vector<10x8xf32>
    %87 = vector.extract_strided_slice %38 {offsets = [0, 24], sizes = [10, 8], strides = [1, 1]} : vector<10x96xf32> to vector<10x8xf32>
    %88 = vector.extract_strided_slice %38 {offsets = [0, 56], sizes = [10, 8], strides = [1, 1]} : vector<10x96xf32> to vector<10x8xf32>
    %89 = vector.extract_strided_slice %38 {offsets = [0, 88], sizes = [10, 8], strides = [1, 1]} : vector<10x96xf32> to vector<10x8xf32>
    %cst_37 = arith.constant dense<0.000000e+00> : vector<10x10xf32>
    %90 = tpu.matmul %87, %88, %cst_37 {dimension_numbers = #tpu.dot_dimension_numbers<[1], [1], [0], [0], [0, 0, 1, 0], [], []>} : vector<10x8xf32>, vector<10x8xf32>, vector<10x10xf32> -> vector<10x10xf32>
    %91 = arith.addf %90, %5 : vector<10x10xf32>
    %cst_38 = arith.constant dense<0xFF800000> : vector<10xf32>
    %92 = vector.multi_reduction <maximumf>, %91, %cst_38 [1] : vector<10x10xf32> to vector<10xf32>
    %93 = vector.shape_cast %92 : vector<10xf32> to vector<10x1xf32>
    %94 = vector.broadcast %93 : vector<10x1xf32> to vector<10x10xf32>
    %95 = arith.subf %91, %94 : vector<10x10xf32>
    %96 = math.exp %95 : vector<10x10xf32>
    %cst_39 = arith.constant dense<0.000000e+00> : vector<10xf32>
    %97 = vector.multi_reduction <add>, %96, %cst_39 [1] : vector<10x10xf32> to vector<10xf32>
    %98 = vector.shape_cast %97 : vector<10xf32> to vector<10x1xf32>
    %99 = tpu.reciprocal %98 {approx = true} : vector<10x1xf32> -> vector<10x1xf32>
    %100 = vector.broadcast %99 : vector<10x1xf32> to vector<10x10xf32>
    %101 = arith.mulf %96, %100 : vector<10x10xf32>
    %cst_40 = arith.constant dense<0.000000e+00> : vector<10x8xf32>
    %102 = tpu.matmul %101, %89, %cst_40 {dimension_numbers = #tpu.dot_dimension_numbers<[1], [0], [0], [1], [0, 0, 1, 1], [], []>} : vector<10x10xf32>, vector<10x8xf32>, vector<10x8xf32> -> vector<10x8xf32>
    %103 = tpu.concatenate %54, %70, %86, %102 in 1 : vector<10x8xf32>, vector<10x8xf32>, vector<10x8xf32>, vector<10x8xf32> -> vector<10x32xf32>
    %c0_41 = arith.constant 0 : index
    %c0_42 = arith.constant 0 : index
    %c0_43 = arith.constant 0 : index
    %104 = vector.load %arg8[%c0_41, %c0_42, %c0_43] : memref<2x32x32xf32, #tpu.memory_space<vmem>>, vector<1x32x32xf32>
    %105 = vector.shape_cast %104 : vector<1x32x32xf32> to vector<32x32xf32>
    %cst_44 = arith.constant dense<0.000000e+00> : vector<10x32xf32>
    %106 = tpu.matmul %103, %105, %cst_44 {dimension_numbers = #tpu.dot_dimension_numbers<[1], [0], [0], [1], [0, 0, 1, 1], [], []>} : vector<10x32xf32>, vector<32x32xf32>, vector<10x32xf32> -> vector<10x32xf32>
    %107 = arith.addf %4, %106 : vector<10x32xf32>
    %c0_45 = arith.constant 0 : index
    %c0_46 = arith.constant 0 : index
    %c0_47 = arith.constant 0 : index
    %108 = vector.load %arg9[%c0_45, %c0_46, %c0_47] : memref<2x1x32xf32, #tpu.memory_space<vmem>>, vector<1x1x32xf32>
    %109 = vector.shape_cast %108 : vector<1x1x32xf32> to vector<1x32xf32>
    %110 = vector.broadcast %109 : vector<1x32xf32> to vector<10x32xf32>
    %111 = arith.addf %107, %110 : vector<10x32xf32>
    %c0_48 = arith.constant 0 : index
    %c0_49 = arith.constant 0 : index
    %c0_50 = arith.constant 0 : index
    %112 = vector.load %arg10[%c0_48, %c0_49, %c0_50] : memref<2x1x32xf32, #tpu.memory_space<vmem>>, vector<1x1x32xf32>
    %113 = vector.shape_cast %112 : vector<1x1x32xf32> to vector<1x32xf32>
    %c0_51 = arith.constant 0 : index
    %c0_52 = arith.constant 0 : index
    %c0_53 = arith.constant 0 : index
    %114 = vector.load %arg11[%c0_51, %c0_52, %c0_53] : memref<2x1x32xf32, #tpu.memory_space<vmem>>, vector<1x1x32xf32>
    %115 = vector.shape_cast %114 : vector<1x1x32xf32> to vector<1x32xf32>
    %cst_54 = arith.constant dense<0.000000e+00> : vector<10xf32>
    %116 = vector.multi_reduction <add>, %111, %cst_54 [1] : vector<10x32xf32> to vector<10xf32>
    %117 = vector.shape_cast %116 : vector<10xf32> to vector<10x1xf32>
    %cst_55 = arith.constant 3.200000e+01 : f32
    %118 = vector.broadcast %cst_55 : f32 to vector<10x1xf32>
    %119 = arith.divf %117, %118 : vector<10x1xf32>
    %120 = vector.broadcast %119 : vector<10x1xf32> to vector<10x32xf32>
    %121 = arith.subf %111, %120 : vector<10x32xf32>
    %122 = arith.mulf %121, %121 : vector<10x32xf32>
    %cst_56 = arith.constant dense<0.000000e+00> : vector<10xf32>
    %123 = vector.multi_reduction <add>, %122, %cst_56 [1] : vector<10x32xf32> to vector<10xf32>
    %124 = vector.shape_cast %123 : vector<10xf32> to vector<10x1xf32>
    %cst_57 = arith.constant 3.200000e+01 : f32
    %125 = vector.broadcast %cst_57 : f32 to vector<10x1xf32>
    %126 = arith.divf %124, %125 : vector<10x1xf32>
    %127 = vector.broadcast %119 : vector<10x1xf32> to vector<10x32xf32>
    %128 = arith.subf %111, %127 : vector<10x32xf32>
    %cst_58 = arith.constant 9.99999997E-7 : f32
    %129 = vector.broadcast %cst_58 : f32 to vector<10x1xf32>
    %130 = arith.addf %126, %129 : vector<10x1xf32>
    %131 = math.rsqrt %130 : vector<10x1xf32>
    %132 = vector.broadcast %131 : vector<10x1xf32> to vector<10x32xf32>
    %133 = arith.mulf %128, %132 : vector<10x32xf32>
    %134 = vector.broadcast %113 : vector<1x32xf32> to vector<10x32xf32>
    %135 = arith.mulf %133, %134 : vector<10x32xf32>
    %136 = vector.broadcast %115 : vector<1x32xf32> to vector<10x32xf32>
    %137 = arith.addf %135, %136 : vector<10x32xf32>
    %c0_59 = arith.constant 0 : index
    %c0_60 = arith.constant 0 : index
    %c0_61 = arith.constant 0 : index
    %138 = vector.load %arg12[%c0_59, %c0_60, %c0_61] : memref<2x32x64xf32, #tpu.memory_space<vmem>>, vector<1x32x64xf32>
    %139 = vector.shape_cast %138 : vector<1x32x64xf32> to vector<32x64xf32>
    %cst_62 = arith.constant dense<0.000000e+00> : vector<10x64xf32>
    %140 = tpu.matmul %137, %139, %cst_62 {dimension_numbers = #tpu.dot_dimension_numbers<[1], [0], [0], [1], [0, 0, 1, 1], [], []>} : vector<10x32xf32>, vector<32x64xf32>, vector<10x64xf32> -> vector<10x64xf32>
    %c0_63 = arith.constant 0 : index
    %c0_64 = arith.constant 0 : index
    %c0_65 = arith.constant 0 : index
    %141 = vector.load %arg13[%c0_63, %c0_64, %c0_65] : memref<2x1x64xf32, #tpu.memory_space<vmem>>, vector<1x1x64xf32>
    %142 = vector.shape_cast %141 : vector<1x1x64xf32> to vector<1x64xf32>
    %143 = vector.broadcast %142 : vector<1x64xf32> to vector<10x64xf32>
    %144 = arith.addf %140, %143 : vector<10x64xf32>
    %cst_66 = arith.constant 5.000000e-01 : f32
    %145 = vector.broadcast %cst_66 : f32 to vector<10x64xf32>
    %146 = arith.mulf %145, %144 : vector<10x64xf32>
    %cst_67 = arith.constant 0.707106769 : f32
    %147 = vector.broadcast %cst_67 : f32 to vector<10x64xf32>
    %148 = arith.mulf %144, %147 : vector<10x64xf32>
    %149 = math.absf %148 : vector<10x64xf32>
    %cst_68 = arith.constant 0.327591091 : f32
    %150 = vector.broadcast %cst_68 : f32 to vector<10x64xf32>
    %151 = arith.mulf %150, %149 : vector<10x64xf32>
    %cst_69 = arith.constant 1.000000e+00 : f32
    %152 = vector.broadcast %cst_69 : f32 to vector<10x64xf32>
    %153 = arith.addf %152, %151 : vector<10x64xf32>
    %cst_70 = arith.constant 1.000000e+00 : f32
    %154 = vector.broadcast %cst_70 : f32 to vector<10x64xf32>
    %155 = arith.divf %154, %153 : vector<10x64xf32>
    %cst_71 = arith.constant 1.06140542 : f32
    %156 = vector.broadcast %cst_71 : f32 to vector<10x64xf32>
    %157 = arith.mulf %156, %155 : vector<10x64xf32>
    %cst_72 = arith.constant -1.45315206 : f32
    %158 = vector.broadcast %cst_72 : f32 to vector<10x64xf32>
    %159 = arith.addf %157, %158 : vector<10x64xf32>
    %160 = arith.mulf %159, %155 : vector<10x64xf32>
    %cst_73 = arith.constant 1.42141378 : f32
    %161 = vector.broadcast %cst_73 : f32 to vector<10x64xf32>
    %162 = arith.addf %160, %161 : vector<10x64xf32>
    %163 = arith.mulf %162, %155 : vector<10x64xf32>
    %cst_74 = arith.constant -0.284496725 : f32
    %164 = vector.broadcast %cst_74 : f32 to vector<10x64xf32>
    %165 = arith.addf %163, %164 : vector<10x64xf32>
    %166 = arith.mulf %165, %155 : vector<10x64xf32>
    %cst_75 = arith.constant 0.254829586 : f32
    %167 = vector.broadcast %cst_75 : f32 to vector<10x64xf32>
    %168 = arith.addf %166, %167 : vector<10x64xf32>
    %169 = arith.mulf %168, %155 : vector<10x64xf32>
    %cst_76 = arith.constant 0.000000e+00 : f32
    %170 = vector.broadcast %cst_76 : f32 to vector<10x64xf32>
    %171 = arith.subf %170, %149 : vector<10x64xf32>
    %172 = arith.mulf %171, %149 : vector<10x64xf32>
    %173 = math.exp %172 : vector<10x64xf32>
    %174 = arith.mulf %169, %173 : vector<10x64xf32>
    %cst_77 = arith.constant 1.000000e+00 : f32
    %175 = vector.broadcast %cst_77 : f32 to vector<10x64xf32>
    %176 = arith.subf %175, %174 : vector<10x64xf32>
    %cst_78 = arith.constant 0.000000e+00 : f32
    %177 = vector.broadcast %cst_78 : f32 to vector<10x64xf32>
    %178 = arith.cmpf olt, %148, %177 : vector<10x64xf32>
    %cst_79 = arith.constant 0.000000e+00 : f32
    %179 = vector.broadcast %cst_79 : f32 to vector<10x64xf32>
    %180 = arith.subf %179, %176 : vector<10x64xf32>
    %181 = arith.select %178, %180, %176 : vector<10x64xi1>, vector<10x64xf32>
    %cst_80 = arith.constant 1.000000e+00 : f32
    %182 = vector.broadcast %cst_80 : f32 to vector<10x64xf32>
    %183 = arith.addf %182, %181 : vector<10x64xf32>
    %184 = arith.mulf %146, %183 : vector<10x64xf32>
    %c0_81 = arith.constant 0 : index
    %c0_82 = arith.constant 0 : index
    %c0_83 = arith.constant 0 : index
    %185 = vector.load %arg14[%c0_81, %c0_82, %c0_83] : memref<2x64x32xf32, #tpu.memory_space<vmem>>, vector<1x64x32xf32>
    %186 = vector.shape_cast %185 : vector<1x64x32xf32> to vector<64x32xf32>
    %cst_84 = arith.constant dense<0.000000e+00> : vector<10x32xf32>
    %187 = tpu.matmul %184, %186, %cst_84 {dimension_numbers = #tpu.dot_dimension_numbers<[1], [0], [0], [1], [0, 0, 1, 1], [], []>} : vector<10x64xf32>, vector<64x32xf32>, vector<10x32xf32> -> vector<10x32xf32>
    %188 = arith.addf %111, %187 : vector<10x32xf32>
    %c0_85 = arith.constant 0 : index
    %c0_86 = arith.constant 0 : index
    %c0_87 = arith.constant 0 : index
    %189 = vector.load %arg15[%c0_85, %c0_86, %c0_87] : memref<2x1x32xf32, #tpu.memory_space<vmem>>, vector<1x1x32xf32>
    %190 = vector.shape_cast %189 : vector<1x1x32xf32> to vector<1x32xf32>
    %191 = vector.broadcast %190 : vector<1x32xf32> to vector<10x32xf32>
    %192 = arith.addf %188, %191 : vector<10x32xf32>
    %c1 = arith.constant 1 : index
    %c0_88 = arith.constant 0 : index
    %c0_89 = arith.constant 0 : index
    %193 = vector.load %arg4[%c1, %c0_88, %c0_89] : memref<2x1x32xf32, #tpu.memory_space<vmem>>, vector<1x1x32xf32>
    %194 = vector.shape_cast %193 : vector<1x1x32xf32> to vector<1x32xf32>
    %c1_90 = arith.constant 1 : index
    %c0_91 = arith.constant 0 : index
    %c0_92 = arith.constant 0 : index
    %195 = vector.load %arg5[%c1_90, %c0_91, %c0_92] : memref<2x1x32xf32, #tpu.memory_space<vmem>>, vector<1x1x32xf32>
    %196 = vector.shape_cast %195 : vector<1x1x32xf32> to vector<1x32xf32>
    %cst_93 = arith.constant dense<0.000000e+00> : vector<10xf32>
    %197 = vector.multi_reduction <add>, %192, %cst_93 [1] : vector<10x32xf32> to vector<10xf32>
    %198 = vector.shape_cast %197 : vector<10xf32> to vector<10x1xf32>
    %cst_94 = arith.constant 3.200000e+01 : f32
    %199 = vector.broadcast %cst_94 : f32 to vector<10x1xf32>
    %200 = arith.divf %198, %199 : vector<10x1xf32>
    %201 = vector.broadcast %200 : vector<10x1xf32> to vector<10x32xf32>
    %202 = arith.subf %192, %201 : vector<10x32xf32>
    %203 = arith.mulf %202, %202 : vector<10x32xf32>
    %cst_95 = arith.constant dense<0.000000e+00> : vector<10xf32>
    %204 = vector.multi_reduction <add>, %203, %cst_95 [1] : vector<10x32xf32> to vector<10xf32>
    %205 = vector.shape_cast %204 : vector<10xf32> to vector<10x1xf32>
    %cst_96 = arith.constant 3.200000e+01 : f32
    %206 = vector.broadcast %cst_96 : f32 to vector<10x1xf32>
    %207 = arith.divf %205, %206 : vector<10x1xf32>
    %208 = vector.broadcast %200 : vector<10x1xf32> to vector<10x32xf32>
    %209 = arith.subf %192, %208 : vector<10x32xf32>
    %cst_97 = arith.constant 9.99999997E-7 : f32
    %210 = vector.broadcast %cst_97 : f32 to vector<10x1xf32>
    %211 = arith.addf %207, %210 : vector<10x1xf32>
    %212 = math.rsqrt %211 : vector<10x1xf32>
    %213 = vector.broadcast %212 : vector<10x1xf32> to vector<10x32xf32>
    %214 = arith.mulf %209, %213 : vector<10x32xf32>
    %215 = vector.broadcast %194 : vector<1x32xf32> to vector<10x32xf32>
    %216 = arith.mulf %214, %215 : vector<10x32xf32>
    %217 = vector.broadcast %196 : vector<1x32xf32> to vector<10x32xf32>
    %218 = arith.addf %216, %217 : vector<10x32xf32>
    %c1_98 = arith.constant 1 : index
    %c0_99 = arith.constant 0 : index
    %c0_100 = arith.constant 0 : index
    %219 = vector.load %arg6[%c1_98, %c0_99, %c0_100] : memref<2x32x96xf32, #tpu.memory_space<vmem>>, vector<1x32x96xf32>
    %220 = vector.shape_cast %219 : vector<1x32x96xf32> to vector<32x96xf32>
    %cst_101 = arith.constant dense<0.000000e+00> : vector<10x96xf32>
    %221 = tpu.matmul %218, %220, %cst_101 {dimension_numbers = #tpu.dot_dimension_numbers<[1], [0], [0], [1], [0, 0, 1, 1], [], []>} : vector<10x32xf32>, vector<32x96xf32>, vector<10x96xf32> -> vector<10x96xf32>
    %c1_102 = arith.constant 1 : index
    %c0_103 = arith.constant 0 : index
    %c0_104 = arith.constant 0 : index
    %222 = vector.load %arg7[%c1_102, %c0_103, %c0_104] : memref<2x1x96xf32, #tpu.memory_space<vmem>>, vector<1x1x96xf32>
    %223 = vector.shape_cast %222 : vector<1x1x96xf32> to vector<1x96xf32>
    %224 = vector.broadcast %223 : vector<1x96xf32> to vector<10x96xf32>
    %225 = arith.addf %221, %224 : vector<10x96xf32>
    %226 = vector.extract_strided_slice %225 {offsets = [0, 0], sizes = [10, 8], strides = [1, 1]} : vector<10x96xf32> to vector<10x8xf32>
    %227 = vector.extract_strided_slice %225 {offsets = [0, 32], sizes = [10, 8], strides = [1, 1]} : vector<10x96xf32> to vector<10x8xf32>
    %228 = vector.extract_strided_slice %225 {offsets = [0, 64], sizes = [10, 8], strides = [1, 1]} : vector<10x96xf32> to vector<10x8xf32>
    %cst_105 = arith.constant dense<0.000000e+00> : vector<10x10xf32>
    %229 = tpu.matmul %226, %227, %cst_105 {dimension_numbers = #tpu.dot_dimension_numbers<[1], [1], [0], [0], [0, 0, 1, 0], [], []>} : vector<10x8xf32>, vector<10x8xf32>, vector<10x10xf32> -> vector<10x10xf32>
    %230 = arith.addf %229, %5 : vector<10x10xf32>
    %cst_106 = arith.constant dense<0xFF800000> : vector<10xf32>
    %231 = vector.multi_reduction <maximumf>, %230, %cst_106 [1] : vector<10x10xf32> to vector<10xf32>
    %232 = vector.shape_cast %231 : vector<10xf32> to vector<10x1xf32>
    %233 = vector.broadcast %232 : vector<10x1xf32> to vector<10x10xf32>
    %234 = arith.subf %230, %233 : vector<10x10xf32>
    %235 = math.exp %234 : vector<10x10xf32>
    %cst_107 = arith.constant dense<0.000000e+00> : vector<10xf32>
    %236 = vector.multi_reduction <add>, %235, %cst_107 [1] : vector<10x10xf32> to vector<10xf32>
    %237 = vector.shape_cast %236 : vector<10xf32> to vector<10x1xf32>
    %238 = tpu.reciprocal %237 {approx = true} : vector<10x1xf32> -> vector<10x1xf32>
    %239 = vector.broadcast %238 : vector<10x1xf32> to vector<10x10xf32>
    %240 = arith.mulf %235, %239 : vector<10x10xf32>
    %cst_108 = arith.constant dense<0.000000e+00> : vector<10x8xf32>
    %241 = tpu.matmul %240, %228, %cst_108 {dimension_numbers = #tpu.dot_dimension_numbers<[1], [0], [0], [1], [0, 0, 1, 1], [], []>} : vector<10x10xf32>, vector<10x8xf32>, vector<10x8xf32> -> vector<10x8xf32>
    %242 = vector.extract_strided_slice %225 {offsets = [0, 8], sizes = [10, 8], strides = [1, 1]} : vector<10x96xf32> to vector<10x8xf32>
    %243 = vector.extract_strided_slice %225 {offsets = [0, 40], sizes = [10, 8], strides = [1, 1]} : vector<10x96xf32> to vector<10x8xf32>
    %244 = vector.extract_strided_slice %225 {offsets = [0, 72], sizes = [10, 8], strides = [1, 1]} : vector<10x96xf32> to vector<10x8xf32>
    %cst_109 = arith.constant dense<0.000000e+00> : vector<10x10xf32>
    %245 = tpu.matmul %242, %243, %cst_109 {dimension_numbers = #tpu.dot_dimension_numbers<[1], [1], [0], [0], [0, 0, 1, 0], [], []>} : vector<10x8xf32>, vector<10x8xf32>, vector<10x10xf32> -> vector<10x10xf32>
    %246 = arith.addf %245, %5 : vector<10x10xf32>
    %cst_110 = arith.constant dense<0xFF800000> : vector<10xf32>
    %247 = vector.multi_reduction <maximumf>, %246, %cst_110 [1] : vector<10x10xf32> to vector<10xf32>
    %248 = vector.shape_cast %247 : vector<10xf32> to vector<10x1xf32>
    %249 = vector.broadcast %248 : vector<10x1xf32> to vector<10x10xf32>
    %250 = arith.subf %246, %249 : vector<10x10xf32>
    %251 = math.exp %250 : vector<10x10xf32>
    %cst_111 = arith.constant dense<0.000000e+00> : vector<10xf32>
    %252 = vector.multi_reduction <add>, %251, %cst_111 [1] : vector<10x10xf32> to vector<10xf32>
    %253 = vector.shape_cast %252 : vector<10xf32> to vector<10x1xf32>
    %254 = tpu.reciprocal %253 {approx = true} : vector<10x1xf32> -> vector<10x1xf32>
    %255 = vector.broadcast %254 : vector<10x1xf32> to vector<10x10xf32>
    %256 = arith.mulf %251, %255 : vector<10x10xf32>
    %cst_112 = arith.constant dense<0.000000e+00> : vector<10x8xf32>
    %257 = tpu.matmul %256, %244, %cst_112 {dimension_numbers = #tpu.dot_dimension_numbers<[1], [0], [0], [1], [0, 0, 1, 1], [], []>} : vector<10x10xf32>, vector<10x8xf32>, vector<10x8xf32> -> vector<10x8xf32>
    %258 = vector.extract_strided_slice %225 {offsets = [0, 16], sizes = [10, 8], strides = [1, 1]} : vector<10x96xf32> to vector<10x8xf32>
    %259 = vector.extract_strided_slice %225 {offsets = [0, 48], sizes = [10, 8], strides = [1, 1]} : vector<10x96xf32> to vector<10x8xf32>
    %260 = vector.extract_strided_slice %225 {offsets = [0, 80], sizes = [10, 8], strides = [1, 1]} : vector<10x96xf32> to vector<10x8xf32>
    %cst_113 = arith.constant dense<0.000000e+00> : vector<10x10xf32>
    %261 = tpu.matmul %258, %259, %cst_113 {dimension_numbers = #tpu.dot_dimension_numbers<[1], [1], [0], [0], [0, 0, 1, 0], [], []>} : vector<10x8xf32>, vector<10x8xf32>, vector<10x10xf32> -> vector<10x10xf32>
    %262 = arith.addf %261, %5 : vector<10x10xf32>
    %cst_114 = arith.constant dense<0xFF800000> : vector<10xf32>
    %263 = vector.multi_reduction <maximumf>, %262, %cst_114 [1] : vector<10x10xf32> to vector<10xf32>
    %264 = vector.shape_cast %263 : vector<10xf32> to vector<10x1xf32>
    %265 = vector.broadcast %264 : vector<10x1xf32> to vector<10x10xf32>
    %266 = arith.subf %262, %265 : vector<10x10xf32>
    %267 = math.exp %266 : vector<10x10xf32>
    %cst_115 = arith.constant dense<0.000000e+00> : vector<10xf32>
    %268 = vector.multi_reduction <add>, %267, %cst_115 [1] : vector<10x10xf32> to vector<10xf32>
    %269 = vector.shape_cast %268 : vector<10xf32> to vector<10x1xf32>
    %270 = tpu.reciprocal %269 {approx = true} : vector<10x1xf32> -> vector<10x1xf32>
    %271 = vector.broadcast %270 : vector<10x1xf32> to vector<10x10xf32>
    %272 = arith.mulf %267, %271 : vector<10x10xf32>
    %cst_116 = arith.constant dense<0.000000e+00> : vector<10x8xf32>
    %273 = tpu.matmul %272, %260, %cst_116 {dimension_numbers = #tpu.dot_dimension_numbers<[1], [0], [0], [1], [0, 0, 1, 1], [], []>} : vector<10x10xf32>, vector<10x8xf32>, vector<10x8xf32> -> vector<10x8xf32>
    %274 = vector.extract_strided_slice %225 {offsets = [0, 24], sizes = [10, 8], strides = [1, 1]} : vector<10x96xf32> to vector<10x8xf32>
    %275 = vector.extract_strided_slice %225 {offsets = [0, 56], sizes = [10, 8], strides = [1, 1]} : vector<10x96xf32> to vector<10x8xf32>
    %276 = vector.extract_strided_slice %225 {offsets = [0, 88], sizes = [10, 8], strides = [1, 1]} : vector<10x96xf32> to vector<10x8xf32>
    %cst_117 = arith.constant dense<0.000000e+00> : vector<10x10xf32>
    %277 = tpu.matmul %274, %275, %cst_117 {dimension_numbers = #tpu.dot_dimension_numbers<[1], [1], [0], [0], [0, 0, 1, 0], [], []>} : vector<10x8xf32>, vector<10x8xf32>, vector<10x10xf32> -> vector<10x10xf32>
    %278 = arith.addf %277, %5 : vector<10x10xf32>
    %cst_118 = arith.constant dense<0xFF800000> : vector<10xf32>
    %279 = vector.multi_reduction <maximumf>, %278, %cst_118 [1] : vector<10x10xf32> to vector<10xf32>
    %280 = vector.shape_cast %279 : vector<10xf32> to vector<10x1xf32>
    %281 = vector.broadcast %280 : vector<10x1xf32> to vector<10x10xf32>
    %282 = arith.subf %278, %281 : vector<10x10xf32>
    %283 = math.exp %282 : vector<10x10xf32>
    %cst_119 = arith.constant dense<0.000000e+00> : vector<10xf32>
    %284 = vector.multi_reduction <add>, %283, %cst_119 [1] : vector<10x10xf32> to vector<10xf32>
    %285 = vector.shape_cast %284 : vector<10xf32> to vector<10x1xf32>
    %286 = tpu.reciprocal %285 {approx = true} : vector<10x1xf32> -> vector<10x1xf32>
    %287 = vector.broadcast %286 : vector<10x1xf32> to vector<10x10xf32>
    %288 = arith.mulf %283, %287 : vector<10x10xf32>
    %cst_120 = arith.constant dense<0.000000e+00> : vector<10x8xf32>
    %289 = tpu.matmul %288, %276, %cst_120 {dimension_numbers = #tpu.dot_dimension_numbers<[1], [0], [0], [1], [0, 0, 1, 1], [], []>} : vector<10x10xf32>, vector<10x8xf32>, vector<10x8xf32> -> vector<10x8xf32>
    %290 = tpu.concatenate %241, %257, %273, %289 in 1 : vector<10x8xf32>, vector<10x8xf32>, vector<10x8xf32>, vector<10x8xf32> -> vector<10x32xf32>
    %c1_121 = arith.constant 1 : index
    %c0_122 = arith.constant 0 : index
    %c0_123 = arith.constant 0 : index
    %291 = vector.load %arg8[%c1_121, %c0_122, %c0_123] : memref<2x32x32xf32, #tpu.memory_space<vmem>>, vector<1x32x32xf32>
    %292 = vector.shape_cast %291 : vector<1x32x32xf32> to vector<32x32xf32>
    %cst_124 = arith.constant dense<0.000000e+00> : vector<10x32xf32>
    %293 = tpu.matmul %290, %292, %cst_124 {dimension_numbers = #tpu.dot_dimension_numbers<[1], [0], [0], [1], [0, 0, 1, 1], [], []>} : vector<10x32xf32>, vector<32x32xf32>, vector<10x32xf32> -> vector<10x32xf32>
    %294 = arith.addf %192, %293 : vector<10x32xf32>
    %c1_125 = arith.constant 1 : index
    %c0_126 = arith.constant 0 : index
    %c0_127 = arith.constant 0 : index
    %295 = vector.load %arg9[%c1_125, %c0_126, %c0_127] : memref<2x1x32xf32, #tpu.memory_space<vmem>>, vector<1x1x32xf32>
    %296 = vector.shape_cast %295 : vector<1x1x32xf32> to vector<1x32xf32>
    %297 = vector.broadcast %296 : vector<1x32xf32> to vector<10x32xf32>
    %298 = arith.addf %294, %297 : vector<10x32xf32>
    %c1_128 = arith.constant 1 : index
    %c0_129 = arith.constant 0 : index
    %c0_130 = arith.constant 0 : index
    %299 = vector.load %arg10[%c1_128, %c0_129, %c0_130] : memref<2x1x32xf32, #tpu.memory_space<vmem>>, vector<1x1x32xf32>
    %300 = vector.shape_cast %299 : vector<1x1x32xf32> to vector<1x32xf32>
    %c1_131 = arith.constant 1 : index
    %c0_132 = arith.constant 0 : index
    %c0_133 = arith.constant 0 : index
    %301 = vector.load %arg11[%c1_131, %c0_132, %c0_133] : memref<2x1x32xf32, #tpu.memory_space<vmem>>, vector<1x1x32xf32>
    %302 = vector.shape_cast %301 : vector<1x1x32xf32> to vector<1x32xf32>
    %cst_134 = arith.constant dense<0.000000e+00> : vector<10xf32>
    %303 = vector.multi_reduction <add>, %298, %cst_134 [1] : vector<10x32xf32> to vector<10xf32>
    %304 = vector.shape_cast %303 : vector<10xf32> to vector<10x1xf32>
    %cst_135 = arith.constant 3.200000e+01 : f32
    %305 = vector.broadcast %cst_135 : f32 to vector<10x1xf32>
    %306 = arith.divf %304, %305 : vector<10x1xf32>
    %307 = vector.broadcast %306 : vector<10x1xf32> to vector<10x32xf32>
    %308 = arith.subf %298, %307 : vector<10x32xf32>
    %309 = arith.mulf %308, %308 : vector<10x32xf32>
    %cst_136 = arith.constant dense<0.000000e+00> : vector<10xf32>
    %310 = vector.multi_reduction <add>, %309, %cst_136 [1] : vector<10x32xf32> to vector<10xf32>
    %311 = vector.shape_cast %310 : vector<10xf32> to vector<10x1xf32>
    %cst_137 = arith.constant 3.200000e+01 : f32
    %312 = vector.broadcast %cst_137 : f32 to vector<10x1xf32>
    %313 = arith.divf %311, %312 : vector<10x1xf32>
    %314 = vector.broadcast %306 : vector<10x1xf32> to vector<10x32xf32>
    %315 = arith.subf %298, %314 : vector<10x32xf32>
    %cst_138 = arith.constant 9.99999997E-7 : f32
    %316 = vector.broadcast %cst_138 : f32 to vector<10x1xf32>
    %317 = arith.addf %313, %316 : vector<10x1xf32>
    %318 = math.rsqrt %317 : vector<10x1xf32>
    %319 = vector.broadcast %318 : vector<10x1xf32> to vector<10x32xf32>
    %320 = arith.mulf %315, %319 : vector<10x32xf32>
    %321 = vector.broadcast %300 : vector<1x32xf32> to vector<10x32xf32>
    %322 = arith.mulf %320, %321 : vector<10x32xf32>
    %323 = vector.broadcast %302 : vector<1x32xf32> to vector<10x32xf32>
    %324 = arith.addf %322, %323 : vector<10x32xf32>
    %c1_139 = arith.constant 1 : index
    %c0_140 = arith.constant 0 : index
    %c0_141 = arith.constant 0 : index
    %325 = vector.load %arg12[%c1_139, %c0_140, %c0_141] : memref<2x32x64xf32, #tpu.memory_space<vmem>>, vector<1x32x64xf32>
    %326 = vector.shape_cast %325 : vector<1x32x64xf32> to vector<32x64xf32>
    %cst_142 = arith.constant dense<0.000000e+00> : vector<10x64xf32>
    %327 = tpu.matmul %324, %326, %cst_142 {dimension_numbers = #tpu.dot_dimension_numbers<[1], [0], [0], [1], [0, 0, 1, 1], [], []>} : vector<10x32xf32>, vector<32x64xf32>, vector<10x64xf32> -> vector<10x64xf32>
    %c1_143 = arith.constant 1 : index
    %c0_144 = arith.constant 0 : index
    %c0_145 = arith.constant 0 : index
    %328 = vector.load %arg13[%c1_143, %c0_144, %c0_145] : memref<2x1x64xf32, #tpu.memory_space<vmem>>, vector<1x1x64xf32>
    %329 = vector.shape_cast %328 : vector<1x1x64xf32> to vector<1x64xf32>
    %330 = vector.broadcast %329 : vector<1x64xf32> to vector<10x64xf32>
    %331 = arith.addf %327, %330 : vector<10x64xf32>
    %cst_146 = arith.constant 5.000000e-01 : f32
    %332 = vector.broadcast %cst_146 : f32 to vector<10x64xf32>
    %333 = arith.mulf %332, %331 : vector<10x64xf32>
    %cst_147 = arith.constant 0.707106769 : f32
    %334 = vector.broadcast %cst_147 : f32 to vector<10x64xf32>
    %335 = arith.mulf %331, %334 : vector<10x64xf32>
    %336 = math.absf %335 : vector<10x64xf32>
    %cst_148 = arith.constant 0.327591091 : f32
    %337 = vector.broadcast %cst_148 : f32 to vector<10x64xf32>
    %338 = arith.mulf %337, %336 : vector<10x64xf32>
    %cst_149 = arith.constant 1.000000e+00 : f32
    %339 = vector.broadcast %cst_149 : f32 to vector<10x64xf32>
    %340 = arith.addf %339, %338 : vector<10x64xf32>
    %cst_150 = arith.constant 1.000000e+00 : f32
    %341 = vector.broadcast %cst_150 : f32 to vector<10x64xf32>
    %342 = arith.divf %341, %340 : vector<10x64xf32>
    %cst_151 = arith.constant 1.06140542 : f32
    %343 = vector.broadcast %cst_151 : f32 to vector<10x64xf32>
    %344 = arith.mulf %343, %342 : vector<10x64xf32>
    %cst_152 = arith.constant -1.45315206 : f32
    %345 = vector.broadcast %cst_152 : f32 to vector<10x64xf32>
    %346 = arith.addf %344, %345 : vector<10x64xf32>
    %347 = arith.mulf %346, %342 : vector<10x64xf32>
    %cst_153 = arith.constant 1.42141378 : f32
    %348 = vector.broadcast %cst_153 : f32 to vector<10x64xf32>
    %349 = arith.addf %347, %348 : vector<10x64xf32>
    %350 = arith.mulf %349, %342 : vector<10x64xf32>
    %cst_154 = arith.constant -0.284496725 : f32
    %351 = vector.broadcast %cst_154 : f32 to vector<10x64xf32>
    %352 = arith.addf %350, %351 : vector<10x64xf32>
    %353 = arith.mulf %352, %342 : vector<10x64xf32>
    %cst_155 = arith.constant 0.254829586 : f32
    %354 = vector.broadcast %cst_155 : f32 to vector<10x64xf32>
    %355 = arith.addf %353, %354 : vector<10x64xf32>
    %356 = arith.mulf %355, %342 : vector<10x64xf32>
    %cst_156 = arith.constant 0.000000e+00 : f32
    %357 = vector.broadcast %cst_156 : f32 to vector<10x64xf32>
    %358 = arith.subf %357, %336 : vector<10x64xf32>
    %359 = arith.mulf %358, %336 : vector<10x64xf32>
    %360 = math.exp %359 : vector<10x64xf32>
    %361 = arith.mulf %356, %360 : vector<10x64xf32>
    %cst_157 = arith.constant 1.000000e+00 : f32
    %362 = vector.broadcast %cst_157 : f32 to vector<10x64xf32>
    %363 = arith.subf %362, %361 : vector<10x64xf32>
    %cst_158 = arith.constant 0.000000e+00 : f32
    %364 = vector.broadcast %cst_158 : f32 to vector<10x64xf32>
    %365 = arith.cmpf olt, %335, %364 : vector<10x64xf32>
    %cst_159 = arith.constant 0.000000e+00 : f32
    %366 = vector.broadcast %cst_159 : f32 to vector<10x64xf32>
    %367 = arith.subf %366, %363 : vector<10x64xf32>
    %368 = arith.select %365, %367, %363 : vector<10x64xi1>, vector<10x64xf32>
    %cst_160 = arith.constant 1.000000e+00 : f32
    %369 = vector.broadcast %cst_160 : f32 to vector<10x64xf32>
    %370 = arith.addf %369, %368 : vector<10x64xf32>
    %371 = arith.mulf %333, %370 : vector<10x64xf32>
    %c1_161 = arith.constant 1 : index
    %c0_162 = arith.constant 0 : index
    %c0_163 = arith.constant 0 : index
    %372 = vector.load %arg14[%c1_161, %c0_162, %c0_163] : memref<2x64x32xf32, #tpu.memory_space<vmem>>, vector<1x64x32xf32>
    %373 = vector.shape_cast %372 : vector<1x64x32xf32> to vector<64x32xf32>
    %cst_164 = arith.constant dense<0.000000e+00> : vector<10x32xf32>
    %374 = tpu.matmul %371, %373, %cst_164 {dimension_numbers = #tpu.dot_dimension_numbers<[1], [0], [0], [1], [0, 0, 1, 1], [], []>} : vector<10x64xf32>, vector<64x32xf32>, vector<10x32xf32> -> vector<10x32xf32>
    %375 = arith.addf %298, %374 : vector<10x32xf32>
    %c1_165 = arith.constant 1 : index
    %c0_166 = arith.constant 0 : index
    %c0_167 = arith.constant 0 : index
    %376 = vector.load %arg15[%c1_165, %c0_166, %c0_167] : memref<2x1x32xf32, #tpu.memory_space<vmem>>, vector<1x1x32xf32>
    %377 = vector.shape_cast %376 : vector<1x1x32xf32> to vector<1x32xf32>
    %378 = vector.broadcast %377 : vector<1x32xf32> to vector<10x32xf32>
    %379 = arith.addf %375, %378 : vector<10x32xf32>
    %c0_168 = arith.constant 0 : index
    %c0_169 = arith.constant 0 : index
    %380 = vector.load %arg16[%c0_168, %c0_169] : memref<1x32xf32, #tpu.memory_space<vmem>>, vector<1x32xf32>
    %c0_170 = arith.constant 0 : index
    %c0_171 = arith.constant 0 : index
    %381 = vector.load %arg17[%c0_170, %c0_171] : memref<1x32xf32, #tpu.memory_space<vmem>>, vector<1x32xf32>
    %cst_172 = arith.constant dense<0.000000e+00> : vector<10xf32>
    %382 = vector.multi_reduction <add>, %379, %cst_172 [1] : vector<10x32xf32> to vector<10xf32>
    %383 = vector.shape_cast %382 : vector<10xf32> to vector<10x1xf32>
    %cst_173 = arith.constant 3.200000e+01 : f32
    %384 = vector.broadcast %cst_173 : f32 to vector<10x1xf32>
    %385 = arith.divf %383, %384 : vector<10x1xf32>
    %386 = vector.broadcast %385 : vector<10x1xf32> to vector<10x32xf32>
    %387 = arith.subf %379, %386 : vector<10x32xf32>
    %388 = arith.mulf %387, %387 : vector<10x32xf32>
    %cst_174 = arith.constant dense<0.000000e+00> : vector<10xf32>
    %389 = vector.multi_reduction <add>, %388, %cst_174 [1] : vector<10x32xf32> to vector<10xf32>
    %390 = vector.shape_cast %389 : vector<10xf32> to vector<10x1xf32>
    %cst_175 = arith.constant 3.200000e+01 : f32
    %391 = vector.broadcast %cst_175 : f32 to vector<10x1xf32>
    %392 = arith.divf %390, %391 : vector<10x1xf32>
    %393 = vector.broadcast %385 : vector<10x1xf32> to vector<10x32xf32>
    %394 = arith.subf %379, %393 : vector<10x32xf32>
    %cst_176 = arith.constant 9.99999997E-7 : f32
    %395 = vector.broadcast %cst_176 : f32 to vector<10x1xf32>
    %396 = arith.addf %392, %395 : vector<10x1xf32>
    %397 = math.rsqrt %396 : vector<10x1xf32>
    %398 = vector.broadcast %397 : vector<10x1xf32> to vector<10x32xf32>
    %399 = arith.mulf %394, %398 : vector<10x32xf32>
    %400 = vector.broadcast %380 : vector<1x32xf32> to vector<10x32xf32>
    %401 = arith.mulf %399, %400 : vector<10x32xf32>
    %402 = vector.broadcast %381 : vector<1x32xf32> to vector<10x32xf32>
    %403 = arith.addf %401, %402 : vector<10x32xf32>
    %c0_177 = arith.constant 0 : index
    %c0_178 = arith.constant 0 : index
    %404 = vector.load %arg18[%c0_177, %c0_178] : memref<32x128xf32, #tpu.memory_space<vmem>>, vector<32x128xf32>
    %cst_179 = arith.constant dense<0.000000e+00> : vector<10x128xf32>
    %405 = tpu.matmul %403, %404, %cst_179 {dimension_numbers = #tpu.dot_dimension_numbers<[1], [0], [0], [1], [0, 0, 1, 1], [], []>} : vector<10x32xf32>, vector<32x128xf32>, vector<10x128xf32> -> vector<10x128xf32>
    %c0_180 = arith.constant 0 : index
    %c0_181 = arith.constant 0 : index
    %406 = vector.load %arg19[%c0_180, %c0_181] : memref<1x128xf32, #tpu.memory_space<vmem>>, vector<1x128xf32>
    %407 = vector.broadcast %406 : vector<1x128xf32> to vector<10x128xf32>
    %408 = arith.addf %405, %407 : vector<10x128xf32>
    %c0_182 = arith.constant 0 : index
    %c0_183 = arith.constant 0 : index
    %409 = vector.load %arg20[%c0_182, %c0_183] : memref<10x128xf32, #tpu.memory_space<vmem>>, vector<10x128xf32>
    tpu.vector_store %arg20[%c0_182, %c0_183], %408 {strides = array<i32>} : memref<10x128xf32, #tpu.memory_space<vmem>>, vector<10x128xf32>,
    return
  }
}

</mosaic_0001>

<bundles_post_ra>
// kernel: _lambda_.1
= control target key start
LH: loop header
LB: loop body
LE: loop exit
PB: predicated region body
PF: predicated region fallthrough
CT: control target
= control target key end

     0   :  { %v3944_v0 = vmov 0.0|0.0   ;;  %vm95_vm0 = vcmask 523264   ;;  %vm181_vm1 = vcmask 261120   ;;  %vm185_vm2 = vcmask 254976   ;;  %s3945_s28 = smov 96   ;;  %s3946_s29 = smov 88   ;;  %s4732_s2 = inlined_call_operand.vmem [shape: f32[192,32], index: 2, kind: input, shape index: {}]   ;;  %s4733_s0 = inlined_call_operand.vmem [shape: f32[10,192], index: 0, kind: input, shape index: {}]   ;;  %s4734_s3 = inlined_call_operand.vmem [shape: f32[10,32], index: 3, kind: input, shape index: {}]   ;;  %s4735_s6 = inlined_call_operand.vmem [shape: f32[2,32,96], index: 6, kind: input, shape index: {}]   ;;  %s4736_s4 = inlined_call_operand.vmem [shape: f32[2,1,32], index: 4, kind: input, shape index: {}, may-alias: {4,10}]   ;;  %s4737_s5 = inlined_call_operand.vmem [shape: f32[2,1,32], index: 5, kind: input, shape index: {}, may-alias: {5,9,11,15}]   ;;  %s4738_s7 = inlined_call_operand.vmem [shape: f32[2,1,96], index: 7, kind: input, shape index: {}]   ;;  %s4739_s1 = inlined_call_operand.vmem [shape: f32[10,10], index: 1, kind: input, shape index: {}]   ;;  %s4740_s8 = inlined_call_operand.vmem [shape: f32[2,32,32], index: 8, kind: input, shape index: {}]   ;;  %s4741_s9 = inlined_call_operand.vmem [shape: f32[2,1,32], index: 9, kind: input, shape index: {}, may-alias: {5,9,11,15}]   ;;  %s4742_s12 = inlined_call_operand.vmem [shape: f32[2,32,64], index: 12, kind: input, shape index: {}]   ;;  %s4743_s10 = inlined_call_operand.vmem [shape: f32[2,1,32], index: 10, kind: input, shape index: {}, may-alias: {4,10}]   ;;  %s4744_s11 = inlined_call_operand.vmem [shape: f32[2,1,32], index: 11, kind: input, shape index: {}, may-alias: {5,9,11,15}]   ;;  %s4745_s14 = inlined_call_operand.vmem [shape: f32[2,64,32], index: 14, kind: input, shape index: {}]   ;;  %s4746_s13 = inlined_call_operand.vmem [shape: f32[2,1,64], index: 13, kind: input, shape index: {}]   ;;  %s4747_s15 = inlined_call_operand.vmem [shape: f32[2,1,32], index: 15, kind: input, shape index: {}, may-alias: {5,9,11,15}]   ;;  %s4748_s18 = inlined_call_operand.vmem [shape: f32[32,128], index: 18, kind: input, shape index: {}]   ;;  %s4749_s16 = inlined_call_operand.vmem [shape: f32[1,32], index: 16, kind: input, shape index: {}]   ;;  %s4750_s17 = inlined_call_operand.vmem [shape: f32[1,32], index: 17, kind: input, shape index: {}]   ;;  %s4751_s19 = inlined_call_operand.vmem [shape: f32[1,128], index: 19, kind: input, shape index: {}]   ;;  %s4752_s20 = inlined_call_operand.vmem [shape: f32[10,128], index: 20, kind: output, shape index: {}]  }
   0x1   :  { %4772 = sst [smem:[#allocation2_spill]] %s4732_s2  ;;  %3526 = vmatprep.subr.bf16.mxu0 %v3944_v0  ;;  %vm324_vm3 = vcmask 64512   ;;  %s3947_s30 = smov 120   ;;  %vm408_vm5 = vcmask 80896   ;;  %vm412_vm6 = vcmask 74752   ;;  %vm443_vm7 = vcmask 1041408  }
   0x2   :  { %4773 = sst [smem:[#allocation3_spill]] %s4733_s0  ;;  %s4777_s23 = sld [smem:[#allocation2_spill]]  ;;  %vm4224_vm4 = vmpackc.low %vm324_vm3, %vm324_vm3  ;;  %vm3949_vm8 = vmmov 1   ;;  %vm1150_vm10 = vcmask 130048   ;;  %vm1153_vm11 = vcmask 195584  }
   0x3   :  { %4774 = sst [smem:[#allocation4_spill]] %s4734_s3  ;;  %s4778_s25 = sld [smem:[#allocation3_spill]]  ;;  %vm4252_vm9 = vmpackc.low %vm443_vm7, %vm3949_vm8 }
   0x4   :  { %4775 = sst [smem:[#allocation5_spill]] %s4735_s6  ;;  %s4779_s6 = sld [smem:[#allocation4_spill]] }
   0x5   :  { %4776 = sst [smem:[#allocation6_spill]] %s4736_s4  ;;  %s4780_s4 = sld [smem:[#allocation5_spill]] }
   0x6   :  { %s4781_s3 = sld [smem:[#allocation6_spill]]  ;;  %s3948_s24 = smov 64  }
   0x7   :  { %s4769_s26 = smov 80   ;;  %s4766_s27 = smov 48  }
   0x8   :  { %v69_v1 = vld [vmem:[%s4777_s23] sm:$0xff]  ;;  %v70_v2 = vld [vmem:[%s4777_s23 + $0x8] sm:$0xff]  ;;  %v71_v3 = vld [vmem:[%s4777_s23 + $0x10] sm:$0xff]  ;;  %s4761_s2 = smov 72   ;;  %s4760_s21 = smov 40  }
   0x9   :  { %v3527_v4 = vpack.c.bf16 %v70_v2, %v69_v1  ;;  %v72_v5 = vld [vmem:[%s4777_s23 + $0x18] sm:$0xff]  ;;  %v73_v7 = vld [vmem:[%s4777_s23 + $0x20] sm:$0xff]  ;;  %v74_v8 = vld [vmem:[%s4777_s23 + $0x28] sm:$0xff]  ;;  %s4764_s0 = smov 8   ;;  %s4758_s22 = smov 16  }
   0xa   :  { %v3530_v6 = vpack.c.bf16 %v72_v5, %v71_v3  ;;  %v3533_v9 = vpack.c.bf16 %v74_v8, %v73_v7  ;;  %v75_v10 = vld [vmem:[%s4777_s23 + $0x30] sm:$0xff]  ;;  %v76_v11 = vld [vmem:[%s4777_s23 + $0x38] sm:$0xff]  ;;  %v66_v12 = vld [vmem:[%s4778_s25 + $0x8] sm:$0xff] }
   0xb   :  { %3528 = vmatpush1.bf16.msra.mxu0 %v3527_v4  ;;  %3050 = vmatprep.mubr.msk.f32.mxu0 %vm95_vm0, %v66_v12  ;;  %v3536_v13 = vpack.c.bf16 %v76_v11, %v75_v10  ;;  %v77_v14 = vld [vmem:[%s4777_s23 + $0x40] sm:$0xff]  ;;  %v78_v15 = vld [vmem:[%s4777_s23 + $0x48] sm:$0xff]  ;;  %v79_v17 = vld [vmem:[%s4777_s23 + $0x50] sm:$0xff] }
   0xc   :  { %3529 = vmatprep.subr.bf16.mxu0 %v3944_v0  ;;  %v3539_v16 = vpack.c.bf16 %v78_v15, %v77_v14  ;;  %v80_v18 = vld [vmem:[%s4777_s23 + $0x58] sm:$0xff]  ;;  %v81_v20 = vld [vmem:[%s4777_s23 + $0x60] sm:$0xff]  ;;  %v82_v21 = vld [vmem:[%s4777_s23 + $0x68] sm:$0xff] }
   0xd   :  { %v3542_v19 = vpack.c.bf16 %v80_v18, %v79_v17  ;;  %v3545_v22 = vpack.c.bf16 %v82_v21, %v81_v20  ;;  %v83_v23 = vld [vmem:[%s4777_s23 + $0x70] sm:$0xff]  ;;  %v84_v24 = vld [vmem:[%s4777_s23 + $0x78] sm:$0xff]  ;;  %v85_v26 = vld [vmem:[%s4777_s23 + $0x80] sm:$0xff] }
   0xe   :  { %v3548_v25 = vpack.c.bf16 %v84_v24, %v83_v23  ;;  %v86_v27 = vld [vmem:[%s4777_s23 + $0x88] sm:$0xff]  ;;  %v87_v29 = vld [vmem:[%s4777_s23 + $0x90] sm:$0xff]  ;;  %v88_v30 = vld [vmem:[%s4777_s23 + $0x98] sm:$0xff] }
   0xf   :  { %3531 = vmatpush1.bf16.msra.mxu0 %v3530_v6  ;;  %v3551_v28 = vpack.c.bf16 %v86_v27, %v85_v26  ;;  %v3554_v31 = vpack.c.bf16 %v88_v30, %v87_v29  ;;  %v89_v32 = vld [vmem:[%s4777_s23 + $0xa0] sm:$0xff]  ;;  %v90_v33 = vld [vmem:[%s4777_s23 + $0xa8] sm:$0xff]  ;;  %v91_v35 = vld [vmem:[%s4777_s23 + $0xb0] sm:$0xff] }
  0x10   :  { %3532 = vmatprep.subr.bf16.mxu0 %v3944_v0  ;;  %v3557_v34 = vpack.c.bf16 %v90_v33, %v89_v32  ;;  %v92_v36 = vld [vmem:[%s4777_s23 + $0xb8] sm:$0xff]  ;;  %v65_v38 = vld [vmem:[%s4778_s25] sm:$0xff]  ;;  %v67_v40 = vld [vmem:[%s4778_s25 + $0x10] sm:$0x3]  ;;  %s3950_s23 = smov 56  }
  0x11   :  { %v3560_v37 = vpack.c.bf16 %v92_v36, %v91_v35  ;;  %v68_v39 = vld [vmem:[%s4778_s25 + $0x18] sm:$0x3]  ;;  %v93_v41 = vld [vmem:[%s4779_s6] sm:$0xff]  ;;  %v94_v45 = vld [vmem:[%s4779_s6 + $0x8] sm:$0x3]  ;;  %s4767_s6 = smov 112  }
  0x12   :  { %v226_v61 = vld [vmem:[%s4780_s4] sm:$0xff]  ;;  %v227_v62 = vld [vmem:[%s4780_s4 + $0x8] sm:$0xff]  ;;  %v228_v63 = vld [vmem:[%s4780_s4 + $0x10] sm:$0xff]  ;;  %s4762_s25 = smov 104  }
  0x13   :  { %3534 = vmatpush1.bf16.msra.mxu0 %v3533_v9  ;;  %v229_v1 = vld [vmem:[%s4780_s4 + $0x18] sm:$0xff]  ;;  %v3052_v10 = vld [vmem:[%s4781_s3] ss:$0 sm:$0xff]  ;;  %v4242_v32 = vld [vmem:[%s4739_s1 + $0x8] sm:$0x3] }
  0x14   :  { %3535 = vmatprep.subr.bf16.mxu0 %v3944_v0  ;;  %v3566_v2 = vpack.c.bf16 %v229_v1, %v228_v63  ;;  %v3053_v12 = vld [vmem:[%s4737_s5] ss:$0 sm:$0xff] }
  0x15   :  { %v4237_v30 = vld [vmem:[%s4739_s1] sm:$0xff] }
  0x17   :  { %3537 = vmatpush1.bf16.msra.mxu0 %v3536_v13 }
  0x18   :  { %3538 = vmatprep.subr.bf16.mxu0 %v3944_v0 }
  0x1b   :  { %3540 = vmatpush1.bf16.msra.mxu0 %v3539_v16 }
  0x1c   :  { %3541 = vmatprep.subr.bf16.mxu0 %v3944_v0 }
  0x1f   :  { %3543 = vmatpush1.bf16.msra.mxu0 %v3542_v19  ;;  %v3054_v19 = vld [vmem:[%s4738_s7] ss:$0 sm:$0xff] }
  0x20   :  { %3544 = vmatprep.subr.bf16.mxu0 %v3944_v0 }
  0x23   :  { %3546 = vmatpush1.bf16.msra.mxu0 %v3545_v22 }
  0x24   :  { %3547 = vmatprep.subr.bf16.mxu0 %v3944_v0 }
  0x27   :  { %3549 = vmatpush1.bf16.msra.mxu0 %v3548_v25 }
  0x28   :  { %3550 = vmatprep.subr.bf16.mxu0 %v3944_v0 }
  0x2b   :  { %3552 = vmatpush1.bf16.msra.mxu0 %v3551_v28 }
  0x2c   :  { %3553 = vmatprep.subr.bf16.mxu0 %v3944_v0 }
  0x2f   :  { %3555 = vmatpush1.bf16.msra.mxu0 %v3554_v31 }
  0x30   :  { %3556 = vmatprep.subr.bf16.mxu0 %v3944_v0 }
  0x33   :  { %3558 = vmatpush1.bf16.msra.mxu0 %v3557_v34 }
  0x34   :  { %3559 = vmatprep.subr.bf16.mxu0 %v3944_v0  ;;  %v3562_v0 = vpack.c.bf16 %v227_v62, %v226_v61 }
  0x36   :  { %3563 = vmatprep.subr.bf16.mxu1 %v3562_v0 }
  0x37   :  { %3561 = vmatpush1.bf16.msra.mxu0 %v3560_v37  ;;  %3565 = vmatpush3.bf16.msra.mxu1 %v3562_v0 }
  0x38   :  { %3567 = vmatprep.subr.bf16.mxu1 %v3566_v2 }
  0x3a   :  { %167 = vmatmul.mubr.f32.vlgmr.msra.gmra.mrb[0].mxu0 %v65_v38 }
  0x3b   :  { %3051 = vmatprep.mubr.msk.f32.mxu0 %vm95_vm0, %v68_v39  ;;  %3569 = vmatpush3.bf16.msra.mxu1 %v3566_v2 }
  0x3e   :  { %172 = vmatmul.mubr.f32.gmra.mrb[2].mxu0 %v67_v40 }
 0x10d   :  { %v168_v42 = vpop.f32.mrb[0].mxu0 }
 0x10e   :  { %v4166_v43 = vadd.f32 %v168_v42, %v93_v41  ;;  %v170_v44 = vpop.f32.mrb[1].mxu0 }
 0x110   :  { %v182_v46 = vsel %vm181_vm1, %v4166_v43, 0.0 }
 0x111   :  { %v173_v47 = vpop.f32.mrb[2].mxu0  ;;  %183 = vadd.xlane.f32.xlu0 %v182_v46 }
 0x112   :  { %v4173_v48 = vadd.f32 %v173_v47, %v94_v45  ;;  %v175_v49 = vpop.f32.mrb[3].mxu0 }
 0x114   :  { %v186_v50 = vsel %vm185_vm2, %v4173_v48, 0.0 }
 0x115   :  { %187 = vadd.xlane.f32.xlu0 %v186_v50 }
 0x19e   :  { %v184_v51 = vpop.xlane.xlu0 %183 }
 0x19f   :  { %v190_v52 = vmul.f32 0.03125, %v184_v51 }
 0x1a1   :  { %v192_v53 = vsub.f32 %v4166_v43, %v190_v52 }
 0x1a2   :  { %v188_v54 = vpop.xlane.xlu0 %187 }
 0x1a3   :  { %v191_v55 = vmul.f32 0.03125, %v188_v54  ;;  %v194_v56 = vmul.f32 %v192_v53, %v192_v53 }
 0x1a5   :  { %v193_v57 = vsub.f32 %v4173_v48, %v191_v55  ;;  %v196_v58 = vsel %vm181_vm1, %v194_v56, 0.0 }
 0x1a6   :  { %197 = vadd.xlane.f32.xlu1 %v196_v58 }
 0x1a7   :  { %v195_v59 = vmul.f32 %v193_v57, %v193_v57 }
 0x1a9   :  { %v199_v60 = vsel %vm185_vm2, %v195_v59, 0.0 }
 0x1aa   :  { %200 = vadd.xlane.f32.xlu1 %v199_v60 }
 0x233   :  { %v198_v3 = vpop.xlane.xlu1 %197 }
 0x234   :  { %v202_v4 = vmul.f32 0.03125, %v198_v3 }
 0x236   :  { %v204_v5 = vadd.f32 1e-06, %v202_v4 }
 0x237   :  { %v201_v6 = vpop.xlane.xlu1 %200 }
 0x238   :  { %3842 = vrsqrt.f32 %v204_v5  ;;  %v203_v7 = vmul.f32 0.03125, %v201_v6 }
 0x23a   :  { %v205_v8 = vadd.f32 1e-06, %v203_v7 }
 0x23c   :  { %3844 = vrsqrt.f32 %v205_v8 }
 0x242   :  { %v3843_v9 = vpop.eup %3842 }
 0x243   :  { %v208_v11 = vmul.f32 %v3843_v9, %v192_v53 }
 0x245   :  { %v216_v13 = vmul.f32 %v3052_v10, %v208_v11 }
 0x246   :  { %v3845_v14 = vpop.eup %3844 }
 0x247   :  { %v209_v15 = vmul.f32 %v3845_v14, %v193_v57  ;;  %v224_v16 = vadd.f32 %v3053_v12, %v216_v13 }
 0x249   :  { %v217_v17 = vmul.f32 %v3052_v10, %v209_v15  ;;  %3307 = vmatprep.mubr.msk.f32.mxu1 %vm181_vm1, %v224_v16 }
 0x24b   :  { %v225_v18 = vadd.f32 %v3053_v12, %v217_v17 }
 0x24d   :  { %3308 = vmatmul.mubr.msk.f32.vlgmr.msra.gmra.mrb[0].mxu1 %vm181_vm1, %v225_v18 }
 0x320   :  { %v3309_v20 = vpop.f32.mrb[0].mxu1 }
 0x321   :  { %v4204_v21 = vadd.f32 %v3309_v20, %v3054_v19  ;;  %v309_v22 = vpop.f32.mrb[1].mxu1 }
 0x322   :  { %v4206_v23 = vadd.f32 %v3054_v19, %v309_v22 }
 0x324   :  { %3314 = vmatprep.mubr.msk.f32.mxu1 %vm324_vm3, %v4206_v23  ;;  %v4212_v24 = vpack.i.bf16 %v4204_v21, %v4206_v23 }
 0x326   :  { %3763 = vrot.lane.b32.xlu0 %v4212_v24, %s3945_s28 }
 0x32a   :  { %3773 = vrot.lane.b32.xlu0 %v4212_v24, %s3946_s29 }
 0x32e   :  { %521 = vrot.lane.b32.xlu0 %v4206_v23, %s3947_s30 }
 0x332   :  { %523 = vrot.lane.b32.xlu0 %v4204_v21, %s3947_s30 }
 0x398   :  { %v3764_v25 = vpop.permute.xlu0 %3763 }
 0x399   :  { %v3766_v26 = vunpack.i.h.bf16 %v3764_v25  ;;  %v3765_v27 = vunpack.i.l.bf16 %v3764_v25 }
 0x39b   :  { %v3570_v29 = vpack.c.bf16 %v3766_v26, %v3765_v27 }
 0x39c   :  { %v3774_v52 = vpop.permute.xlu0 %3773 }
 0x39d   :  { %3572 = vmatprep.subr.msk.bf16.mxu1 %vm4224_vm4, %v3570_v29  ;;  %v3776_v54 = vunpack.i.h.bf16 %v3774_v52  ;;  %v3775_v55 = vunpack.i.l.bf16 %v3774_v52 }
 0x39e   :  { %3575 = vmatpush3.bf16.xpose.msk.msra.mxu1 %vm4224_vm4, %v3570_v29 }
 0x39f   :  { %v3582_v60 = vpack.c.bf16 %v3776_v54, %v3775_v55 }
 0x3a0   :  { %v522_v1 = vpop.permute.xlu0 %521 }
 0x3a4   :  { %v524_v2 = vpop.permute.xlu0 %523 }
 0x3a5   :  { %3315 = vmatmul.mubr.msk.f32.vlgmr.msra.gmra.mrb[2].mxu1 %vm324_vm3, %v4204_v21 }
 0x478   :  { %v3316_v31 = vpop.f32.mrb[2].mxu1 }
 0x479   :  { %v399_v33 = vpop.f32.mrb[3].mxu1  ;;  %v405_v35 = vadd.f32 %v3316_v31, %v4242_v32 }
 0x47a   :  { %v400_v34 = vadd.f32 %v399_v33, %v4237_v30 }
 0x47b   :  { %v413_v37 = vsel %vm412_vm6, %v405_v35, -inf }
 0x47c   :  { %v409_v36 = vsel %vm408_vm5, %v400_v34, -inf }
 0x47d   :  { %410 = vmax.xlane.f32.xlu1 %v409_v36 }
 0x481   :  { %414 = vmax.xlane.f32.xlu1 %v413_v37 }
 0x50a   :  { %v411_v38 = vpop.xlane.xlu1 %410 }
 0x50b   :  { %v416_v39 = vsub.f32 %v400_v34, %v411_v38 }
 0x50d   :  { %v418_v42 = vmul.f32 1.442695, %v416_v39 }
 0x50e   :  { %v415_v40 = vpop.xlane.xlu1 %414 }
 0x50f   :  { %v417_v41 = vsub.f32 %v405_v35, %v415_v40 }
 0x511   :  { %v420_v44 = vmul.f32 1.442695, %v417_v41 }
 0x513   :  { %3846 = vpow2.f32 %v420_v44 }
 0x514   :  { %3848 = vpow2.f32 %v418_v42 }
 0x51d   :  { %v3847_v45 = vpop.eup %3846 }
 0x51e   :  { %v425_v46 = vsel %vm412_vm6, %v3847_v45, 0.0  ;;  %v3849_v47 = vpop.eup %3848 }
 0x51f   :  { %426 = vadd.xlane.f32.xlu1 %v425_v46  ;;  %v422_v49 = vsel %vm408_vm5, %v3849_v47, 0.0 }
 0x523   :  { %423 = vadd.xlane.f32.xlu1 %v422_v49 }
 0x534   :  { %3768 = vrot.lane.b32.xlu1 %v4212_v24, %s3948_s24 }
 0x5ac   :  { %v427_v50 = vpop.xlane.xlu1 %426 }
 0x5ad   :  { %3850 = vrcp.f32 %v427_v50 }
 0x5b0   :  { %v424_v51 = vpop.xlane.xlu1 %423 }
 0x5b1   :  { %3852 = vrcp.f32 %v424_v51 }
 0x5b4   :  { %v3769_v53 = vpop.permute.xlu1 %3768 }
 0x5b5   :  { %v3771_v56 = vunpack.i.h.bf16 %v3769_v53  ;;  %v3770_v57 = vunpack.i.l.bf16 %v3769_v53 }
 0x5b7   :  { %v3576_v59 = vpack.c.bf16 %v3771_v56, %v3770_v57  ;;  %v3851_v61 = vpop.eup %3850 }
 0x5b8   :  { %v431_v0 = vmul.f32 %v3851_v61, %v3847_v45 }
 0x5b9   :  { %3578 = vmatprep.subr.msk.bf16.mxu1 %vm4252_vm9, %v3576_v59 }
 0x5ba   :  { %3581 = vmatpush3.bf16.msk.msra.mxu1 %vm4252_vm9, %v3576_v59 }
 0x5bb   :  { %v3853_v62 = vpop.eup %3852  ;;  %3584 = vmatprep.subr.msk.bf16.mxu1 %vm4224_vm4, %v3582_v60 }
 0x5bc   :  { %v430_v63 = vmul.f32 %v3853_v62, %v3849_v47 }
 0x5be   :  { %3321 = vmatprep.mubr.msk.f32.mxu1 %vm408_vm5, %v430_v63 }
 0x5bf   :  { %3322 = vmatmul.mubr.msk.f32.vlgmr.msra.gmra.mrb[4].mxu1 %vm408_vm5, %v431_v0 }
 0x5c0   :  { %3328 = vmatprep.mubr.msk.f32.mxu1 %vm324_vm3, %v522_v1 }
 0x5c3   :  { %3587 = vmatpush3.bf16.xpose.msk.msra.mxu1 %vm4224_vm4, %v3582_v60 }
 0x5ca   :  { %3329 = vmatmul.mubr.msk.f32.vlgmr.msra.gmra.mrb[6].mxu1 %vm324_vm3, %v524_v2 }
 0x692   :  { %v4268_v3 = vpop.f32.mrb[4].mxu1 }
 0x693   :  { %v4270_v4 = vpop.f32.mrb[5].mxu1 }
 0x69d   :  { %v3330_v5 = vpop.f32.mrb[6].mxu1 }
 0x69e   :  { %v609_v6 = vadd.f32 %v3330_v5, %v4242_v32  ;;  %v603_v7 = vpop.f32.mrb[7].mxu1 }
 0x69f   :  { %v604_v8 = vadd.f32 %v603_v7, %v4237_v30 }
 0x6a0   :  { %v615_v9 = vsel %vm412_vm6, %v609_v6, -inf }
 0x6a1   :  { %616 = vmax.xlane.f32.xlu0 %v615_v9  ;;  %v612_v10 = vsel %vm408_vm5, %v604_v8, -inf }
 0x6a2   :  { %613 = vmax.xlane.f32.xlu1 %v612_v10 }
 0x6b3   :  { %3778 = vrot.lane.b32.xlu1 %v4212_v24, %s3950_s23 }
 0x6b7   :  { %722 = vrot.lane.b32.xlu1 %v4206_v23, %s4767_s6 }
 0x6bb   :  { %724 = vrot.lane.b32.xlu1 %v4204_v21, %s4767_s6  ;;  %s4792_s6 = smov 8  }
 0x72e   :  { %v617_v11 = vpop.xlane.xlu0 %616 }
 0x72f   :  { %v619_v12 = vsub.f32 %v609_v6, %v617_v11  ;;  %v614_v13 = vpop.xlane.xlu1 %613 }
 0x730   :  { %v618_v14 = vsub.f32 %v604_v8, %v614_v13 }
 0x731   :  { %v622_v15 = vmul.f32 1.442695, %v619_v12 }
 0x732   :  { %v620_v16 = vmul.f32 1.442695, %v618_v14 }
 0x733   :  { %3854 = vpow2.f32 %v622_v15  ;;  %v3779_v17 = vpop.permute.xlu1 %3778 }
 0x734   :  { %v3781_v18 = vunpack.i.h.bf16 %v3779_v17  ;;  %v3780_v19 = vunpack.i.l.bf16 %v3779_v17  ;;  %3856 = vpow2.f32 %v620_v16 }
 0x736   :  { %v3588_v20 = vpack.c.bf16 %v3781_v18, %v3780_v19 }
 0x737   :  { %v723_v41 = vpop.permute.xlu1 %722 }
 0x738   :  { %3590 = vmatprep.subr.msk.bf16.mxu1 %vm4252_vm9, %v3588_v20 }
 0x739   :  { %3593 = vmatpush3.bf16.msk.msra.mxu1 %vm4252_vm9, %v3588_v20 }
 0x73b   :  { %v725_v42 = vpop.permute.xlu1 %724 }
 0x73d   :  { %v3855_v22 = vpop.eup %3854 }
 0x73e   :  { %v627_v25 = vsel %vm412_vm6, %v3855_v22, 0.0  ;;  %v3857_v26 = vpop.eup %3856 }
 0x73f   :  { %628 = vadd.xlane.f32.xlu0 %v627_v25  ;;  %v624_v27 = vsel %vm408_vm5, %v3857_v26, 0.0 }
 0x743   :  { %625 = vadd.xlane.f32.xlu0 %v624_v27 }
 0x759   :  { %3783 = vrot.lane.b32.xlu0 %v4212_v24, %s4769_s26  ;;  %s4793_s26 = smov 16  }
 0x7cc   :  { %v629_v29 = vpop.xlane.xlu0 %628 }
 0x7cd   :  { %3858 = vrcp.f32 %v629_v29 }
 0x7d0   :  { %v626_v31 = vpop.xlane.xlu0 %625 }
 0x7d1   :  { %3860 = vrcp.f32 %v626_v31 }
 0x7d4   :  { %v3784_v33 = vpop.permute.xlu0 %3783 }
 0x7d5   :  { %v3786_v34 = vunpack.i.h.bf16 %v3784_v33  ;;  %v3785_v35 = vunpack.i.l.bf16 %v3784_v33 }
 0x7d7   :  { %v3594_v36 = vpack.c.bf16 %v3786_v34, %v3785_v35  ;;  %v3859_v37 = vpop.eup %3858 }
 0x7d8   :  { %v633_v40 = vmul.f32 %v3859_v37, %v3855_v22 }
 0x7d9   :  { %3596 = vmatprep.subr.msk.bf16.mxu1 %vm4224_vm4, %v3594_v36 }
 0x7db   :  { %v3861_v38 = vpop.eup %3860 }
 0x7dc   :  { %v632_v39 = vmul.f32 %v3861_v38, %v3857_v26 }
 0x7de   :  { %3335 = vmatprep.mubr.msk.f32.mxu1 %vm408_vm5, %v632_v39 }
 0x7df   :  { %3336 = vmatmul.mubr.msk.f32.vlgmr.msra.gmra.mrb[8].mxu1 %vm408_vm5, %v633_v40 }
 0x7e0   :  { %3599 = vmatpush3.bf16.xpose.msk.msra.mxu1 %vm4224_vm4, %v3594_v36  ;;  %3342 = vmatprep.mubr.msk.f32.mxu1 %vm324_vm3, %v723_v41 }
 0x7e7   :  { %3343 = vmatmul.mubr.msk.f32.vlgmr.msra.gmra.mrb[10].mxu1 %vm324_vm3, %v725_v42 }
 0x8b2   :  { %v4298_v44 = vpop.f32.mrb[8].mxu1 }
 0x8b3   :  { %v4300_v45 = vpop.f32.mrb[9].mxu1 }
 0x8ba   :  { %v3344_v46 = vpop.f32.mrb[10].mxu1 }
 0x8bb   :  { %v810_v47 = vadd.f32 %v3344_v46, %v4242_v32  ;;  %v804_v49 = vpop.f32.mrb[11].mxu1 }
 0x8bc   :  { %v805_v50 = vadd.f32 %v804_v49, %v4237_v30 }
 0x8bd   :  { %v816_v51 = vsel %vm412_vm6, %v810_v47, -inf }
 0x8be   :  { %817 = vmax.xlane.f32.xlu0 %v816_v51  ;;  %v813_v52 = vsel %vm408_vm5, %v805_v50, -inf }
 0x8bf   :  { %814 = vmax.xlane.f32.xlu1 %v813_v52  ;;  %v1156_v52 = vld [vmem:[%s4740_s8] sm:$0xff] }
 0x8d0   :  { %3788 = vrot.lane.b32.xlu1 %v4212_v24, %s4766_s27 }
 0x8d4   :  { %923 = vrot.lane.b32.xlu1 %v4206_v23, %s4762_s25 }
 0x8d8   :  { %925 = vrot.lane.b32.xlu1 %v4204_v21, %s4762_s25 }
 0x94b   :  { %v818_v53 = vpop.xlane.xlu0 %817 }
 0x94c   :  { %v820_v54 = vsub.f32 %v810_v47, %v818_v53  ;;  %v815_v55 = vpop.xlane.xlu1 %814  ;;  %v1158_v53 = vld [vmem:[%s4740_s8 + $0x10] sm:$0xff] }
 0x94d   :  { %v819_v56 = vsub.f32 %v805_v50, %v815_v55  ;;  %v1159_v55 = vld [vmem:[%s4740_s8 + $0x18] sm:$0xff] }
 0x94e   :  { %v823_v57 = vmul.f32 1.442695, %v820_v54 }
 0x94f   :  { %v821_v59 = vmul.f32 1.442695, %v819_v56  ;;  %v3622_v56 = vpack.c.bf16 %v1159_v55, %v1158_v53  ;;  %v1443_v53 = vld [vmem:[%s4745_s14 + $0x8] sm:$0xff]  ;;  %v1444_v55 = vld [vmem:[%s4745_s14 + $0x10] sm:$0xff] }
 0x950   :  { %3862 = vpow2.f32 %v823_v57  ;;  %v3789_v60 = vpop.permute.xlu1 %3788 }
 0x951   :  { %v3791_v61 = vunpack.i.h.bf16 %v3789_v60  ;;  %v3790_v62 = vunpack.i.l.bf16 %v3789_v60  ;;  %3864 = vpow2.f32 %v821_v59 }
 0x953   :  { %v3600_v63 = vpack.c.bf16 %v3791_v61, %v3790_v62 }
 0x954   :  { %v924_v14 = vpop.permute.xlu1 %923 }
 0x955   :  { %3602 = vmatprep.subr.msk.bf16.mxu1 %vm4252_vm9, %v3600_v63 }
 0x956   :  { %3605 = vmatpush3.bf16.msk.msra.mxu1 %vm4252_vm9, %v3600_v63 }
 0x958   :  { %v926_v15 = vpop.permute.xlu1 %925 }
 0x95a   :  { %v3863_v23 = vpop.eup %3862 }
 0x95b   :  { %v828_v21 = vsel %vm412_vm6, %v3863_v23, 0.0  ;;  %v3865_v0 = vpop.eup %3864 }
 0x95c   :  { %829 = vadd.xlane.f32.xlu0 %v828_v21  ;;  %v825_v1 = vsel %vm408_vm5, %v3865_v0, 0.0 }
 0x960   :  { %826 = vadd.xlane.f32.xlu0 %v825_v1 }
 0x976   :  { %3793 = vrot.lane.b32.xlu0 %v4212_v24, %s4761_s2 }
 0x9e9   :  { %v830_v2 = vpop.xlane.xlu0 %829 }
 0x9ea   :  { %3866 = vrcp.f32 %v830_v2 }
 0x9ed   :  { %v827_v5 = vpop.xlane.xlu0 %826 }
 0x9ee   :  { %3868 = vrcp.f32 %v827_v5 }
 0x9f1   :  { %v3794_v6 = vpop.permute.xlu0 %3793 }
 0x9f2   :  { %v3796_v7 = vunpack.i.h.bf16 %v3794_v6  ;;  %v3795_v8 = vunpack.i.l.bf16 %v3794_v6 }
 0x9f4   :  { %v3606_v9 = vpack.c.bf16 %v3796_v7, %v3795_v8  ;;  %v3867_v10 = vpop.eup %3866  ;;  %v3087_v8 = vld [vmem:[%s4741_s9] ss:$0 sm:$0xff] }
 0x9f5   :  { %v834_v13 = vmul.f32 %v3867_v10, %v3863_v23 }
 0x9f6   :  { %3608 = vmatprep.subr.msk.bf16.mxu1 %vm4224_vm4, %v3606_v9 }
 0x9f8   :  { %v3869_v11 = vpop.eup %3868 }
 0x9f9   :  { %v833_v12 = vmul.f32 %v3869_v11, %v3865_v0 }
 0x9fb   :  { %3349 = vmatprep.mubr.msk.f32.mxu1 %vm408_vm5, %v833_v12 }
 0x9fc   :  { %3350 = vmatmul.mubr.msk.f32.vlgmr.msra.gmra.mrb[12].mxu1 %vm408_vm5, %v834_v13 }
 0x9fd   :  { %3611 = vmatpush3.bf16.xpose.msk.msra.mxu1 %vm4224_vm4, %v3606_v9  ;;  %3356 = vmatprep.mubr.msk.f32.mxu1 %vm324_vm3, %v924_v14 }
 0xa04   :  { %3357 = vmatmul.mubr.msk.f32.vlgmr.msra.gmra.mrb[14].mxu1 %vm324_vm3, %v926_v15 }
 0xacf   :  { %v3351_v16 = vpop.f32.mrb[12].mxu1 }
 0xad0   :  { %v914_v17 = vpop.f32.mrb[13].mxu1 }
 0xad7   :  { %v3358_v18 = vpop.f32.mrb[14].mxu1 }
 0xad8   :  { %v1011_v19 = vadd.f32 %v3358_v18, %v4242_v32  ;;  %v1005_v20 = vpop.f32.mrb[15].mxu1 }
 0xad9   :  { %v1006_v22 = vadd.f32 %v1005_v20, %v4237_v30 }
 0xada   :  { %v1017_v25 = vsel %vm412_vm6, %v1011_v19, -inf }
 0xadb   :  { %1018 = vmax.xlane.f32.xlu0 %v1017_v25  ;;  %v1014_v26 = vsel %vm408_vm5, %v1006_v22, -inf }
 0xadc   :  { %1015 = vmax.xlane.f32.xlu1 %v1014_v26  ;;  %v1296_v26 = vld [vmem:[%s4742_s12] sm:$0xff] }
 0xaed   :  { %3798 = vrot.lane.b32.xlu1 %v4212_v24, %s4760_s21  ;;  %s4770_s21 = smov 24  }
 0xaf1   :  { %1128 = vrot.lane.b32.xlu1 %v4298_v44, %s4764_s0 }
 0xaf5   :  { %1134 = vrot.lane.b32.xlu1 %v914_v17, %s4758_s22 }
 0xaf9   :  { %1136 = vrot.lane.b32.xlu1 %v3351_v16, %s4758_s22  ;;  %s4791_s22 = smov 40  }
 0xb68   :  { %v1019_v27 = vpop.xlane.xlu0 %1018 }
 0xb69   :  { %v1021_v29 = vsub.f32 %v1011_v19, %v1019_v27  ;;  %v1016_v31 = vpop.xlane.xlu1 %1015  ;;  %v1297_v27 = vld [vmem:[%s4742_s12 + $0x8] sm:$0xff] }
 0xb6a   :  { %v1020_v33 = vsub.f32 %v1006_v22, %v1016_v31  ;;  %v1298_v31 = vld [vmem:[%s4742_s12 + $0x10] sm:$0xff] }
 0xb6b   :  { %v1024_v34 = vmul.f32 1.442695, %v1021_v29  ;;  %v3626_v29 = vpack.c.bf16 %v1297_v27, %v1296_v26 }
 0xb6c   :  { %v1022_v35 = vmul.f32 1.442695, %v1020_v33  ;;  %v1299_v33 = vld [vmem:[%s4742_s12 + $0x18] sm:$0xff] }
 0xb6d   :  { %v3799_v36 = vpop.permute.xlu1 %3798 }
 0xb6e   :  { %3870 = vpow2.f32 %v1022_v35  ;;  %v3801_v37 = vunpack.i.h.bf16 %v3799_v36  ;;  %v3800_v38 = vunpack.i.l.bf16 %v3799_v36 }
 0xb6f   :  { %3872 = vpow2.f32 %v1024_v34  ;;  %v3630_v34 = vpack.c.bf16 %v1299_v33, %v1298_v31 }
 0xb70   :  { %v3612_v24 = vpack.c.bf16 %v3801_v37, %v3800_v38 }
 0xb71   :  { %v1129_v60 = vpop.permute.xlu1 %1128 }
 0xb72   :  { %3614 = vmatprep.subr.msk.bf16.mxu0 %vm4252_vm9, %v3612_v24  ;;  %v1149_v0 = vsel %vm324_vm3, %v4268_v3, %v1129_v60  ;;  %v1447_v60 = vld [vmem:[%s4745_s14 + $0x28] sm:$0xff] }
 0xb73   :  { %3617 = vmatpush3.bf16.msk.msra.mxu0 %vm4252_vm9, %v3612_v24 }
 0xb74   :  { %3627 = vmatprep.subr.bf16.mxu0 %v3626_v29 }
 0xb75   :  { %v1135_v61 = vpop.permute.xlu1 %1134 }
 0xb78   :  { %v3871_v39 = vpop.eup %3870 }
 0xb79   :  { %v1026_v40 = vsel %vm408_vm5, %v3871_v39, 0.0  ;;  %v3873_v41 = vpop.eup %3872  ;;  %v1137_v63 = vpop.permute.xlu1 %1136 }
 0xb7a   :  { %1027 = vadd.xlane.f32.xlu0 %v1026_v40  ;;  %v1029_v42 = vsel %vm412_vm6, %v3873_v41, 0.0  ;;  %v1152_v5 = vsel %vm1150_vm10, %v1149_v0, %v1137_v63  ;;  %v1449_v63 = vld [vmem:[%s4745_s14 + $0x38] sm:$0xff] }
 0xb7e   :  { %1030 = vadd.xlane.f32.xlu0 %v1029_v42 }
 0xb94   :  { %1126 = vrot.lane.b32.xlu0 %v4300_v45, %s4764_s0  ;;  %v1157_v45 = vld [vmem:[%s4740_s8 + $0x8] sm:$0xff] }
 0xb95   :  { %v3618_v54 = vpack.c.bf16 %v1157_v45, %v1156_v52  ;;  %v1442_v45 = vld [vmem:[%s4745_s14] sm:$0xff] }
 0xb97   :  { %3619 = vmatprep.subr.bf16.mxu1 %v3618_v54 }
 0xb98   :  { %3621 = vmatpush3.bf16.msra.mxu1 %v3618_v54  ;;  %v3634_v54 = vpack.c.bf16 %v1443_v53, %v1442_v45 }
 0xb99   :  { %3623 = vmatprep.subr.bf16.mxu1 %v3622_v56 }
 0xb9c   :  { %3625 = vmatpush3.bf16.msra.mxu1 %v3622_v56  ;;  %v1445_v56 = vld [vmem:[%s4745_s14 + $0x18] sm:$0xff] }
 0xb9d   :  { %3635 = vmatprep.subr.bf16.mxu1 %v3634_v54 }
 0xc07   :  { %v1028_v44 = vpop.xlane.xlu0 %1027 }
 0xc08   :  { %3874 = vrcp.f32 %v1028_v44  ;;  %v3089_v44 = vld [vmem:[%s4744_s11] ss:$0 sm:$0xff] }
 0xc0b   :  { %v1031_v46 = vpop.xlane.xlu0 %1030 }
 0xc0c   :  { %3876 = vrcp.f32 %v1031_v46 }
 0xc0f   :  { %v1127_v62 = vpop.permute.xlu0 %1126 }
 0xc10   :  { %v1148_v23 = vsel %vm324_vm3, %v4270_v4, %v1127_v62  ;;  %v1448_v62 = vld [vmem:[%s4745_s14 + $0x30] sm:$0xff] }
 0xc11   :  { %v1151_v1 = vsel %vm1150_vm10, %v1148_v23, %v1135_v61  ;;  %v3646_v23 = vpack.c.bf16 %v1449_v63, %v1448_v62  ;;  %v3095_v63 = vld [vmem:[%s4747_s15] ss:$0 sm:$0xff] }
 0xc12   :  { %v3875_v47 = vpop.eup %3874 }
 0xc13   :  { %v1034_v49 = vmul.f32 %v3875_v47, %v3871_v39 }
 0xc15   :  { %3363 = vmatprep.mubr.msk.f32.mxu0 %vm408_vm5, %v1034_v49 }
 0xc16   :  { %v3877_v50 = vpop.eup %3876 }
 0xc17   :  { %v1035_v51 = vmul.f32 %v3877_v50, %v3873_v41  ;;  %v3088_v41 = vld [vmem:[%s4743_s10] ss:$0 sm:$0xff] }
 0xc19   :  { %3364 = vmatmul.mubr.msk.f32.vlgmr.msra.gmra.mrb[4].mxu0 %vm408_vm5, %v1035_v51 }
 0xc1a   :  { %3629 = vmatpush3.bf16.msra.mxu0 %v3626_v29 }
 0xc1b   :  { %3631 = vmatprep.subr.bf16.mxu0 %v3630_v34 }
 0xc1e   :  { %3633 = vmatpush3.bf16.msra.mxu0 %v3630_v34 }
 0xcec   :  { %v3365_v57 = vpop.f32.mrb[4].mxu0 }
 0xced   :  { %1144 = vrot.lane.b32.xlu1 %v3365_v57, %s4770_s21  ;;  %v1115_v59 = vpop.f32.mrb[5].mxu0  ;;  %v3638_v57 = vpack.c.bf16 %v1445_v56, %v1444_v55 }
 0xcee   :  { %1142 = vrot.lane.b32.xlu0 %v1115_v59, %s4770_s21  ;;  %v1446_v59 = vld [vmem:[%s4745_s14 + $0x20] sm:$0xff] }
 0xcef   :  { %v3642_v61 = vpack.c.bf16 %v1447_v60, %v1446_v59 }
 0xd5f   :  { %v1145_v21 = vpop.permute.xlu1 %1144 }
 0xd60   :  { %v1143_v2 = vpop.permute.xlu0 %1142  ;;  %v1155_v7 = vsel %vm1153_vm11, %v1152_v5, %v1145_v21  ;;  %v3090_v21 = vld [vmem:[%s4746_s13] ss:$0 sm:$0xff] }
 0xd61   :  { %v1154_v6 = vsel %vm1153_vm11, %v1151_v1, %v1143_v2 }
 0xd62   :  { %3374 = vmatprep.mubr.msk.f32.mxu1 %vm181_vm1, %v1154_v6 }
 0xd63   :  { %3375 = vmatmul.mubr.msk.f32.vlgmr.msra.gmra.mrb[16].mxu1 %vm181_vm1, %v1155_v7 }
 0xd64   :  { %3637 = vmatpush3.bf16.msra.mxu1 %v3634_v54 }
 0xd65   :  { %3639 = vmatprep.subr.bf16.mxu1 %v3638_v57 }
 0xd68   :  { %3641 = vmatpush3.bf16.msra.mxu1 %v3638_v57 }
 0xd69   :  { %3643 = vmatprep.subr.bf16.mxu1 %v3642_v61 }
 0xd6c   :  { %3645 = vmatpush3.bf16.msra.mxu1 %v3642_v61 }
 0xd6d   :  { %3647 = vmatprep.subr.bf16.mxu1 %v3646_v23 }
 0xd70   :  { %3649 = vmatpush3.bf16.msra.mxu1 %v3646_v23 }
 0xe36   :  { %v3376_v4 = vpop.f32.mrb[16].mxu1 }
 0xe37   :  { %v1242_v3 = vadd.f32 %v3376_v4, %v4173_v48  ;;  %v1232_v9 = vpop.f32.mrb[17].mxu1 }
 0xe38   :  { %v1241_v10 = vadd.f32 %v1232_v9, %v4166_v43 }
 0xe39   :  { %v4377_v11 = vadd.f32 %v3087_v8, %v1242_v3 }
 0xe3a   :  { %v4379_v12 = vadd.f32 %v3087_v8, %v1241_v10 }
 0xe3b   :  { %v1257_v13 = vsel %vm185_vm2, %v4377_v11, 0.0 }
 0xe3c   :  { %1258 = vadd.xlane.f32.xlu1 %v1257_v13  ;;  %v1254_v14 = vsel %vm181_vm1, %v4379_v12, 0.0 }
 0xe3d   :  { %1255 = vadd.xlane.f32.xlu0 %v1254_v14 }
 0xec9   :  { %v1259_v15 = vpop.xlane.xlu1 %1258 }
 0xeca   :  { %v1261_v16 = vmul.f32 0.03125, %v1259_v15  ;;  %v1256_v17 = vpop.xlane.xlu0 %1255 }
 0xecb   :  { %v1260_v18 = vmul.f32 0.03125, %v1256_v17 }
 0xecc   :  { %v1263_v48 = vsub.f32 %v4377_v11, %v1261_v16 }
 0xecd   :  { %v1262_v43 = vsub.f32 %v4379_v12, %v1260_v18 }
 0xece   :  { %v1265_v22 = vmul.f32 %v1263_v48, %v1263_v48 }
 0xecf   :  { %v1264_v19 = vmul.f32 %v1262_v43, %v1262_v43 }
 0xed0   :  { %v1269_v25 = vsel %vm185_vm2, %v1265_v22, 0.0 }
 0xed1   :  { %v1266_v20 = vsel %vm181_vm1, %v1264_v19, 0.0 }
 0xed2   :  { %1267 = vadd.xlane.f32.xlu0 %v1266_v20 }
 0xed6   :  { %1270 = vadd.xlane.f32.xlu0 %v1269_v25 }
 0xf5f   :  { %v1268_v35 = vpop.xlane.xlu0 %1267 }
 0xf60   :  { %v1272_v36 = vmul.f32 0.03125, %v1268_v35 }
 0xf62   :  { %v1274_v37 = vadd.f32 1e-06, %v1272_v36 }
 0xf63   :  { %v1271_v38 = vpop.xlane.xlu0 %1270 }
 0xf64   :  { %3878 = vrsqrt.f32 %v1274_v37  ;;  %v1273_v24 = vmul.f32 0.03125, %v1271_v38 }
 0xf66   :  { %v1275_v39 = vadd.f32 1e-06, %v1273_v24 }
 0xf68   :  { %3880 = vrsqrt.f32 %v1275_v39 }
 0xf6e   :  { %v3879_v40 = vpop.eup %3878 }
 0xf6f   :  { %v1278_v42 = vmul.f32 %v3879_v40, %v1262_v43 }
 0xf71   :  { %v1286_v46 = vmul.f32 %v3088_v41, %v1278_v42 }
 0xf72   :  { %v3881_v47 = vpop.eup %3880 }
 0xf73   :  { %v1279_v49 = vmul.f32 %v3881_v47, %v1263_v48  ;;  %v1294_v50 = vadd.f32 %v3089_v44, %v1286_v46 }
 0xf75   :  { %v1287_v51 = vmul.f32 %v3088_v41, %v1279_v49  ;;  %3385 = vmatprep.mubr.msk.f32.mxu0 %vm181_vm1, %v1294_v50 }
 0xf77   :  { %v1295_v52 = vadd.f32 %v3089_v44, %v1287_v51 }
 0xf79   :  { %3386 = vmatmul.mubr.msk.f32.vlgmr.msra.gmra.mrb[6].mxu0 %vm181_vm1, %v1295_v52 }
0x104c   :  { %v3387_v0 = vpop.f32.mrb[6].mxu0 }
0x104d   :  { %v1385_v1 = vadd.f32 %v3387_v0, %v3090_v21  ;;  %v1379_v2 = vpop.f32.mrb[7].mxu0 }
0x104e   :  { %v1380_v5 = vadd.f32 %v3090_v21, %v1379_v2 }
0x104f   :  { %v1391_v6 = vmul.f32 0.70710677, %v1385_v1  ;;  %v1389_v59 = vmul.f32 0.5, %v1385_v1 }
0x1050   :  { %v1390_v7 = vmul.f32 0.70710677, %v1380_v5  ;;  %v1388_v56 = vmul.f32 0.5, %v1380_v5 }
0x1051   :  { %v1393_v4 = vand.u32 2147483647, %v1391_v6  ;;  %vm1433_vm12 = vcmp.lt.f32.partialorder %v1391_v6, 0.0 }
0x1052   :  { %v1392_v8 = vand.u32 2147483647, %v1390_v7  ;;  %vm1432_vm13 = vcmp.lt.f32.partialorder %v1390_v7, 0.0 }
0x1053   :  { %v1395_v3 = vmul.f32 0.3275911, %v1393_v4  ;;  %v1421_v14 = vsub.f32 0.0, %v1393_v4 }
0x1054   :  { %v1394_v9 = vmul.f32 0.3275911, %v1392_v8  ;;  %v1420_v15 = vsub.f32 0.0, %v1392_v8 }
0x1055   :  { %v1397_v10 = vadd.f32 1.0, %v1395_v3  ;;  %v1423_v17 = vmul.f32 %v1421_v14, %v1393_v4 }
0x1056   :  { %v1396_v13 = vadd.f32 1.0, %v1394_v9  ;;  %v1422_v43 = vmul.f32 %v1420_v15, %v1392_v8  ;;  %v3100_v15 = vld [vmem:[%s4780_s4 + $0x20] sm:$0xff] }
0x1057   :  { %3882 = vrcp.f32 %v1397_v10  ;;  %v1426_v22 = vmul.f32 1.442695, %v1423_v17 }
0x1058   :  { %3884 = vrcp.f32 %v1396_v13  ;;  %v1424_v27 = vmul.f32 1.442695, %v1422_v43 }
0x1059   :  { %3886 = vpow2.f32 %v1426_v22 }
0x105a   :  { %3888 = vpow2.f32 %v1424_v27 }
0x1061   :  { %v3883_v16 = vpop.eup %3882 }
0x1062   :  { %v3885_v18 = vpop.eup %3884  ;;  %v1403_v48 = vmul.f32 1.0614054, %v3883_v16 }
0x1063   :  { %v1402_v19 = vmul.f32 1.0614054, %v3885_v18  ;;  %v3887_v42 = vpop.eup %3886 }
0x1064   :  { %v1405_v20 = vadd.f32 -1.4531521, %v1403_v48  ;;  %v3889_v46 = vpop.eup %3888  ;;  %v3103_v48 = vld [vmem:[%s4780_s4 + $0x38] sm:$0xff] }
0x1065   :  { %v1404_v25 = vadd.f32 -1.4531521, %v1402_v19 }
0x1066   :  { %v1407_v26 = vmul.f32 %v3883_v16, %v1405_v20 }
0x1067   :  { %v1406_v29 = vmul.f32 %v3885_v18, %v1404_v25 }
0x1068   :  { %v1409_v31 = vadd.f32 1.4214138, %v1407_v26 }
0x1069   :  { %v1408_v33 = vadd.f32 1.4214138, %v1406_v29 }
0x106a   :  { %v1411_v34 = vmul.f32 %v3883_v16, %v1409_v31  ;;  %v3098_v31 = vld [vmem:[%s4781_s3 + $0x1] ss:$0 sm:$0xff]  ;;  %s4794_s3 = smov 24  }
0x106b   :  { %v1410_v35 = vmul.f32 %v3885_v18, %v1408_v33 }
0x106c   :  { %v1413_v36 = vadd.f32 -0.28449672, %v1411_v34 }
0x106d   :  { %v1412_v37 = vadd.f32 -0.28449672, %v1410_v35  ;;  %v3099_v35 = vld [vmem:[%s4737_s5 + $0x1] ss:$0 sm:$0xff]  ;;  %s4786_s5 = smov 80  }
0x106e   :  { %v1415_v38 = vmul.f32 %v3883_v16, %v1413_v36 }
0x106f   :  { %v1414_v24 = vmul.f32 %v3885_v18, %v1412_v37 }
0x1070   :  { %v1417_v39 = vadd.f32 0.2548296, %v1415_v38 }
0x1071   :  { %v1416_v40 = vadd.f32 0.2548296, %v1414_v24 }
0x1072   :  { %v1419_v41 = vmul.f32 %v3883_v16, %v1417_v39  ;;  %v3101_v16 = vld [vmem:[%s4780_s4 + $0x28] sm:$0xff] }
0x1073   :  { %v1418_v44 = vmul.f32 %v3885_v18, %v1416_v40  ;;  %v3650_v17 = vpack.c.bf16 %v3101_v16, %v3100_v15  ;;  %v3102_v18 = vld [vmem:[%s4780_s4 + $0x30] sm:$0xff]  ;;  %v3105_v40 = vld [vmem:[%s4738_s7 + $0x1] ss:$0 sm:$0xff]  ;;  %s4787_s7 = smov 112  }
0x1074   :  { %v1429_v47 = vmul.f32 %v3887_v42, %v1419_v41  ;;  %v3654_v43 = vpack.c.bf16 %v3103_v48, %v3102_v18 }
0x1075   :  { %v1428_v49 = vmul.f32 %v3889_v46, %v1418_v44  ;;  %3651 = vmatprep.subr.bf16.mxu0 %v3650_v17 }
0x1076   :  { %v1431_v50 = vsub.f32 1.0, %v1429_v47  ;;  %3653 = vmatpush3.bf16.msra.mxu0 %v3650_v17 }
0x1077   :  { %v1430_v51 = vsub.f32 1.0, %v1428_v49  ;;  %3655 = vmatprep.subr.bf16.mxu0 %v3654_v43 }
0x1078   :  { %v1435_v52 = vsub.f32 0.0, %v1431_v50 }
0x1079   :  { %v1434_v45 = vsub.f32 0.0, %v1430_v51 }
0x107a   :  { %v1437_v53 = vsel %vm1433_vm12, %v1435_v52, %v1431_v50  ;;  %3657 = vmatpush3.bf16.msra.mxu0 %v3654_v43 }
0x107b   :  { %v1439_v54 = vadd.f32 1.0, %v1437_v53  ;;  %v1436_v55 = vsel %vm1432_vm13, %v1434_v45, %v1430_v51 }
0x107c   :  { %v1438_v57 = vadd.f32 1.0, %v1436_v55 }
0x107d   :  { %v1441_v61 = vmul.f32 %v1439_v54, %v1389_v59 }
0x107e   :  { %v1440_v60 = vmul.f32 %v1438_v57, %v1388_v56 }
0x1080   :  { %3404 = vmatprep.mubr.msk.f32.mxu1 %vm95_vm0, %v1440_v60 }
0x1081   :  { %3405 = vmatmul.mubr.msk.f32.vlgmr.msra.gmra.mrb[18].mxu1 %vm95_vm0, %v1441_v61 }
0x1154   :  { %v3406_v62 = vpop.f32.mrb[18].mxu1 }
0x1155   :  { %v1532_v23 = vadd.f32 %v3406_v62, %v4377_v11  ;;  %v1522_v21 = vpop.f32.mrb[19].mxu1 }
0x1156   :  { %v1531_v0 = vadd.f32 %v1522_v21, %v4379_v12 }
0x1157   :  { %v4443_v2 = vadd.f32 %v3095_v63, %v1532_v23 }
0x1158   :  { %v4445_v5 = vadd.f32 %v3095_v63, %v1531_v0 }
0x1159   :  { %v1549_v1 = vsel %vm185_vm2, %v4443_v2, 0.0 }
0x115a   :  { %1550 = vadd.xlane.f32.xlu1 %v1549_v1  ;;  %v1546_v6 = vsel %vm181_vm1, %v4445_v5, 0.0 }
0x115b   :  { %1547 = vadd.xlane.f32.xlu0 %v1546_v6 }
0x11e7   :  { %v1551_v7 = vpop.xlane.xlu1 %1550 }
0x11e8   :  { %v1553_v4 = vmul.f32 0.03125, %v1551_v7  ;;  %v1548_v8 = vpop.xlane.xlu0 %1547 }
0x11e9   :  { %v1552_v3 = vmul.f32 0.03125, %v1548_v8 }
0x11ea   :  { %v1555_v11 = vsub.f32 %v4443_v2, %v1553_v4 }
0x11eb   :  { %v1554_v12 = vsub.f32 %v4445_v5, %v1552_v3 }
0x11ec   :  { %v1557_v9 = vmul.f32 %v1555_v11, %v1555_v11 }
0x11ed   :  { %v1556_v10 = vmul.f32 %v1554_v12, %v1554_v12 }
0x11ee   :  { %v1561_v13 = vsel %vm185_vm2, %v1557_v9, 0.0 }
0x11ef   :  { %1562 = vadd.xlane.f32.xlu1 %v1561_v13  ;;  %v1558_v14 = vsel %vm181_vm1, %v1556_v10, 0.0 }
0x11f0   :  { %1559 = vadd.xlane.f32.xlu0 %v1558_v14 }
0x127c   :  { %v1563_v19 = vpop.xlane.xlu1 %1562 }
0x127d   :  { %v1565_v20 = vmul.f32 0.03125, %v1563_v19  ;;  %v1560_v22 = vpop.xlane.xlu0 %1559 }
0x127e   :  { %v1564_v25 = vmul.f32 0.03125, %v1560_v22 }
0x127f   :  { %v1567_v26 = vadd.f32 1e-06, %v1565_v20 }
0x1280   :  { %v1566_v27 = vadd.f32 1e-06, %v1564_v25 }
0x1281   :  { %3890 = vrsqrt.f32 %v1567_v26 }
0x1282   :  { %3892 = vrsqrt.f32 %v1566_v27 }
0x128b   :  { %v3891_v29 = vpop.eup %3890 }
0x128c   :  { %v3893_v33 = vpop.eup %3892  ;;  %v1571_v34 = vmul.f32 %v3891_v29, %v1555_v11 }
0x128d   :  { %v1570_v36 = vmul.f32 %v3893_v33, %v1554_v12 }
0x128e   :  { %v1579_v37 = vmul.f32 %v3098_v31, %v1571_v34 }
0x128f   :  { %v1578_v38 = vmul.f32 %v3098_v31, %v1570_v36 }
0x1290   :  { %v1587_v24 = vadd.f32 %v3099_v35, %v1579_v37 }
0x1291   :  { %v1586_v39 = vadd.f32 %v3099_v35, %v1578_v38 }
0x1293   :  { %3415 = vmatprep.mubr.msk.f32.mxu0 %vm181_vm1, %v1586_v39 }
0x1294   :  { %3416 = vmatmul.mubr.msk.f32.vlgmr.msra.gmra.mrb[8].mxu0 %vm181_vm1, %v1587_v24 }
0x1367   :  { %v3417_v41 = vpop.f32.mrb[8].mxu0 }
0x1368   :  { %v4478_v42 = vadd.f32 %v3417_v41, %v3105_v40  ;;  %v1673_v44 = vpop.f32.mrb[9].mxu0 }
0x1369   :  { %v4480_v46 = vadd.f32 %v3105_v40, %v1673_v44 }
0x136b   :  { %3422 = vmatprep.mubr.msk.f32.mxu0 %vm324_vm3, %v4480_v46  ;;  %v4486_v47 = vpack.i.bf16 %v4478_v42, %v4480_v46 }
0x136d   :  { %3808 = vrot.lane.b32.xlu1 %v4486_v47, %s3946_s29  ;;  %3803 = vrot.lane.b32.xlu0 %v4486_v47, %s3945_s28 }
0x1371   :  { %1881 = vrot.lane.b32.xlu1 %v4480_v46, %s3947_s30 }
0x1375   :  { %1883 = vrot.lane.b32.xlu1 %v4478_v42, %s3947_s30 }
0x13df   :  { %v3809_v49 = vpop.permute.xlu1 %3808  ;;  %v3804_v50 = vpop.permute.xlu0 %3803 }
0x13e0   :  { %v3811_v51 = vunpack.i.h.bf16 %v3809_v49  ;;  %v3810_v52 = vunpack.i.l.bf16 %v3809_v49  ;;  %v3806_v45 = vunpack.i.h.bf16 %v3804_v50  ;;  %v3805_v53 = vunpack.i.l.bf16 %v3804_v50 }
0x13e2   :  { %v3658_v54 = vpack.c.bf16 %v3806_v45, %v3805_v53  ;;  %v3670_v55 = vpack.c.bf16 %v3811_v51, %v3810_v52 }
0x13e3   :  { %v1882_v56 = vpop.permute.xlu1 %1881 }
0x13e4   :  { %3660 = vmatprep.subr.msk.bf16.mxu0 %vm4224_vm4, %v3658_v54 }
0x13e5   :  { %3663 = vmatpush3.bf16.xpose.msk.msra.mxu0 %vm4224_vm4, %v3658_v54 }
0x13e6   :  { %3672 = vmatprep.subr.msk.bf16.mxu0 %vm4224_vm4, %v3670_v55 }
0x13e7   :  { %v1884_v57 = vpop.permute.xlu1 %1883 }
0x13ec   :  { %3423 = vmatmul.mubr.msk.f32.vlgmr.msra.gmra.mrb[10].mxu0 %vm324_vm3, %v4478_v42 }
0x13ed   :  { %3675 = vmatpush3.bf16.xpose.msk.msra.mxu0 %vm4224_vm4, %v3670_v55  ;;  %3436 = vmatprep.mubr.msk.f32.mxu0 %vm324_vm3, %v1882_v56 }
0x13f4   :  { %3437 = vmatmul.mubr.msk.f32.vlgmr.msra.gmra.mrb[12].mxu0 %vm324_vm3, %v1884_v57 }
0x14bf   :  { %v3424_v59 = vpop.f32.mrb[10].mxu0 }
0x14c0   :  { %v1768_v60 = vadd.f32 %v3424_v59, %v4242_v32  ;;  %v1762_v61 = vpop.f32.mrb[11].mxu0 }
0x14c1   :  { %v1763_v62 = vadd.f32 %v1762_v61, %v4237_v30 }
0x14c2   :  { %v1774_v63 = vsel %vm412_vm6, %v1768_v60, -inf }
0x14c3   :  { %1775 = vmax.xlane.f32.xlu1 %v1774_v63  ;;  %v1771_v23 = vsel %vm408_vm5, %v1763_v62, -inf }
0x14c4   :  { %1772 = vmax.xlane.f32.xlu0 %v1771_v23 }
0x14c7   :  { %v3438_v21 = vpop.f32.mrb[12].mxu0 }
0x14c8   :  { %v1963_v0 = vpop.f32.mrb[13].mxu0  ;;  %v1969_v6 = vadd.f32 %v3438_v21, %v4242_v32  ;;  %v3942_v21 = vld [vmem:[%s4739_s1 + $0x8] sm:$0x3] }
0x14c9   :  { %v1964_v1 = vadd.f32 %v1963_v0, %v4237_v30 }
0x14ca   :  { %v1975_v4 = vsel %vm412_vm6, %v1969_v6, -inf }
0x14cb   :  { %v1972_v7 = vsel %vm408_vm5, %v1964_v1, -inf }
0x14cc   :  { %1973 = vmax.xlane.f32.xlu0 %v1972_v7 }
0x14d0   :  { %1976 = vmax.xlane.f32.xlu0 %v1975_v4 }
0x1550   :  { %v1776_v8 = vpop.xlane.xlu1 %1775 }
0x1551   :  { %v1778_v3 = vsub.f32 %v1768_v60, %v1776_v8  ;;  %v1773_v11 = vpop.xlane.xlu0 %1772 }
0x1552   :  { %v1777_v12 = vsub.f32 %v1763_v62, %v1773_v11 }
0x1553   :  { %v1781_v9 = vmul.f32 1.442695, %v1778_v3 }
0x1554   :  { %v1779_v10 = vmul.f32 1.442695, %v1777_v12 }
0x1555   :  { %3894 = vpow2.f32 %v1781_v9 }
0x1556   :  { %3896 = vpow2.f32 %v1779_v10 }
0x1559   :  { %v1974_v13 = vpop.xlane.xlu0 %1973 }
0x155a   :  { %v1978_v14 = vsub.f32 %v1964_v1, %v1974_v13 }
0x155c   :  { %v1980_v15 = vmul.f32 1.442695, %v1978_v14 }
0x155d   :  { %v1977_v30 = vpop.xlane.xlu0 %1976 }
0x155e   :  { %3898 = vpow2.f32 %v1980_v15  ;;  %v1979_v32 = vsub.f32 %v1969_v6, %v1977_v30  ;;  %v3943_v6 = vld [vmem:[%s4739_s1] sm:$0xff]  ;;  %s4790_s1 = smov 72  }
0x155f   :  { %v3895_v16 = vpop.eup %3894 }
0x1560   :  { %v3897_v17 = vpop.eup %3896  ;;  %v1982_v18 = vmul.f32 1.442695, %v1979_v32  ;;  %v1786_v48 = vsel %vm412_vm6, %v3895_v16, 0.0 }
0x1561   :  { %1787 = vadd.xlane.f32.xlu1 %v1786_v48  ;;  %v1783_v43 = vsel %vm408_vm5, %v3897_v17, 0.0 }
0x1562   :  { %3900 = vpow2.f32 %v1982_v18  ;;  %1784 = vadd.xlane.f32.xlu0 %v1783_v43 }
0x1568   :  { %v3899_v19 = vpop.eup %3898 }
0x1569   :  { %v1984_v20 = vsel %vm408_vm5, %v3899_v19, 0.0 }
0x156a   :  { %1985 = vadd.xlane.f32.xlu0 %v1984_v20 }
0x156c   :  { %v3901_v22 = vpop.eup %3900 }
0x156d   :  { %v1987_v25 = vsel %vm412_vm6, %v3901_v22, 0.0 }
0x156e   :  { %1988 = vadd.xlane.f32.xlu1 %v1987_v25 }
0x157f   :  { %3818 = vrot.lane.b32.xlu1 %v4486_v47, %s3950_s23  ;;  %s4789_s23 = smov 104  }
0x1580   :  { %3813 = vrot.lane.b32.xlu0 %v4486_v47, %s3948_s24  ;;  %s4788_s24 = smov 48  }
0x1583   :  { %3823 = vrot.lane.b32.xlu1 %v4486_v47, %s4786_s5 }
0x1584   :  { %2084 = vrot.lane.b32.xlu0 %v4478_v42, %s4787_s7 }
0x1587   :  { %2082 = vrot.lane.b32.xlu1 %v4480_v46, %s4787_s7 }
0x15ee   :  { %v1788_v27 = vpop.xlane.xlu1 %1787 }
0x15ef   :  { %v1785_v26 = vpop.xlane.xlu0 %1784 }
0x15f0   :  { %3902 = vrcp.f32 %v1785_v26 }
0x15f1   :  { %3904 = vrcp.f32 %v1788_v27 }
0x15f7   :  { %v1986_v29 = vpop.xlane.xlu0 %1985 }
0x15f8   :  { %3906 = vrcp.f32 %v1986_v29 }
0x15fa   :  { %v3903_v31 = vpop.eup %3902 }
0x15fb   :  { %v1989_v33 = vpop.xlane.xlu1 %1988  ;;  %v3814_v34 = vpop.permute.xlu0 %3813  ;;  %v1791_v35 = vmul.f32 %v3903_v31, %v3897_v17 }
0x15fc   :  { %3908 = vrcp.f32 %v1989_v33  ;;  %v3816_v36 = vunpack.i.h.bf16 %v3814_v34  ;;  %v3815_v37 = vunpack.i.l.bf16 %v3814_v34  ;;  %v3905_v24 = vpop.eup %3904 }
0x15fd   :  { %3429 = vmatprep.mubr.msk.f32.mxu1 %vm408_vm5, %v1791_v35  ;;  %v1792_v49 = vmul.f32 %v3905_v24, %v3895_v16 }
0x15fe   :  { %v3664_v38 = vpack.c.bf16 %v3816_v36, %v3815_v37 }
0x15ff   :  { %v3819_v39 = vpop.permute.xlu1 %3818  ;;  %v2085_v59 = vpop.permute.xlu0 %2084 }
0x1600   :  { %v3821_v40 = vunpack.i.h.bf16 %v3819_v39  ;;  %v3820_v41 = vunpack.i.l.bf16 %v3819_v39  ;;  %3666 = vmatprep.subr.msk.bf16.mxu1 %vm4252_vm9, %v3664_v38 }
0x1601   :  { %3669 = vmatpush3.bf16.msk.msra.mxu1 %vm4252_vm9, %v3664_v38 }
0x1602   :  { %v3907_v44 = vpop.eup %3906  ;;  %v3676_v50 = vpack.c.bf16 %v3821_v40, %v3820_v41 }
0x1603   :  { %v3824_v51 = vpop.permute.xlu1 %3823  ;;  %v1992_v52 = vmul.f32 %v3907_v44, %v3899_v19 }
0x1604   :  { %v3826_v45 = vunpack.i.h.bf16 %v3824_v51  ;;  %v3825_v53 = vunpack.i.l.bf16 %v3824_v51  ;;  %3430 = vmatmul.mubr.msk.f32.vlgmr.msra.gmra.mrb[20].mxu1 %vm408_vm5, %v1792_v49  ;;  %3678 = vmatprep.subr.msk.bf16.mxu1 %vm4252_vm9, %v3676_v50 }
0x1605   :  { %3681 = vmatpush3.bf16.msk.msra.mxu1 %vm4252_vm9, %v3676_v50  ;;  %3443 = vmatprep.mubr.msk.f32.mxu1 %vm408_vm5, %v1992_v52 }
0x1606   :  { %v3909_v54 = vpop.eup %3908  ;;  %v3682_v55 = vpack.c.bf16 %v3826_v45, %v3825_v53 }
0x1607   :  { %v1993_v56 = vmul.f32 %v3909_v54, %v3901_v22  ;;  %v2083_v57 = vpop.permute.xlu1 %2082 }
0x1608   :  { %3684 = vmatprep.subr.msk.bf16.mxu1 %vm4224_vm4, %v3682_v55 }
0x1609   :  { %3444 = vmatmul.mubr.msk.f32.vlgmr.msra.gmra.mrb[22].mxu1 %vm408_vm5, %v1993_v56 }
0x160a   :  { %3450 = vmatprep.mubr.msk.f32.mxu1 %vm324_vm3, %v2083_v57 }
0x160e   :  { %3687 = vmatpush3.bf16.xpose.msk.msra.mxu1 %vm4224_vm4, %v3682_v55 }
0x1615   :  { %3451 = vmatmul.mubr.msk.f32.vlgmr.msra.gmra.mrb[24].mxu1 %vm324_vm3, %v2085_v59 }
0x16d7   :  { %v4548_v60 = vpop.f32.mrb[20].mxu1 }
0x16d8   :  { %v4550_v61 = vpop.f32.mrb[21].mxu1 }
0x16dc   :  { %v4552_v62 = vpop.f32.mrb[22].mxu1 }
0x16dd   :  { %v4554_v63 = vpop.f32.mrb[23].mxu1 }
0x16e8   :  { %v3452_v23 = vpop.f32.mrb[24].mxu1 }
0x16e9   :  { %v2170_v0 = vadd.f32 %v3942_v21, %v3452_v23  ;;  %v2164_v1 = vpop.f32.mrb[25].mxu1 }
0x16ea   :  { %v2165_v7 = vadd.f32 %v3943_v6, %v2164_v1  ;;  %v3136_v1 = vld [vmem:[%s4740_s8 + $0x20] sm:$0xff] }
0x16eb   :  { %v2176_v4 = vsel %vm412_vm6, %v2170_v0, -inf }
0x16ec   :  { %2177 = vmax.xlane.f32.xlu0 %v2176_v4  ;;  %v2173_v8 = vsel %vm408_vm5, %v2165_v7, -inf  ;;  %v3139_v4 = vld [vmem:[%s4740_s8 + $0x38] sm:$0xff] }
0x16ed   :  { %2174 = vmax.xlane.f32.xlu1 %v2173_v8 }
0x16fe   :  { %3828 = vrot.lane.b32.xlu1 %v4486_v47, %s4788_s24 }
0x1702   :  { %2283 = vrot.lane.b32.xlu1 %v4480_v46, %s4789_s23 }
0x1706   :  { %2285 = vrot.lane.b32.xlu1 %v4478_v42, %s4789_s23 }
0x1779   :  { %v2178_v3 = vpop.xlane.xlu0 %2177 }
0x177a   :  { %v2180_v11 = vsub.f32 %v2170_v0, %v2178_v3  ;;  %v2175_v12 = vpop.xlane.xlu1 %2174 }
0x177b   :  { %v2179_v9 = vsub.f32 %v2165_v7, %v2175_v12 }
0x177c   :  { %v2183_v10 = vmul.f32 1.442695, %v2180_v11 }
0x177d   :  { %v2181_v13 = vmul.f32 1.442695, %v2179_v9 }
0x177e   :  { %3910 = vpow2.f32 %v2183_v10  ;;  %v3829_v14 = vpop.permute.xlu1 %3828 }
0x177f   :  { %v3831_v15 = vunpack.i.h.bf16 %v3829_v14  ;;  %v3830_v30 = vunpack.i.l.bf16 %v3829_v14  ;;  %3912 = vpow2.f32 %v2181_v13 }
0x1781   :  { %v3688_v32 = vpack.c.bf16 %v3831_v15, %v3830_v30 }
0x1782   :  { %v2284_v31 = vpop.permute.xlu1 %2283 }
0x1783   :  { %3690 = vmatprep.subr.msk.bf16.mxu0 %vm4252_vm9, %v3688_v32 }
0x1784   :  { %3693 = vmatpush3.bf16.msk.msra.mxu0 %vm4252_vm9, %v3688_v32 }
0x1786   :  { %v2286_v33 = vpop.permute.xlu1 %2285 }
0x1788   :  { %v3911_v46 = vpop.eup %3910 }
0x1789   :  { %v2188_v42 = vsel %vm412_vm6, %v3911_v46, 0.0  ;;  %v3913_v16 = vpop.eup %3912 }
0x178a   :  { %2189 = vadd.xlane.f32.xlu0 %v2188_v42  ;;  %v2185_v17 = vsel %vm408_vm5, %v3913_v16, 0.0 }
0x178e   :  { %2186 = vadd.xlane.f32.xlu0 %v2185_v17 }
0x17a4   :  { %3833 = vrot.lane.b32.xlu0 %v4486_v47, %s4790_s1 }
0x1817   :  { %v2190_v18 = vpop.xlane.xlu0 %2189 }
0x1818   :  { %3914 = vrcp.f32 %v2190_v18 }
0x181b   :  { %v2187_v48 = vpop.xlane.xlu0 %2186 }
0x181c   :  { %3916 = vrcp.f32 %v2187_v48 }
0x181f   :  { %v3834_v43 = vpop.permute.xlu0 %3833 }
0x1820   :  { %v3836_v19 = vunpack.i.h.bf16 %v3834_v43  ;;  %v3835_v20 = vunpack.i.l.bf16 %v3834_v43 }
0x1822   :  { %v3694_v22 = vpack.c.bf16 %v3836_v19, %v3835_v20  ;;  %v3915_v25 = vpop.eup %3914 }
0x1823   :  { %v2194_v29 = vmul.f32 %v3915_v25, %v3911_v46 }
0x1824   :  { %3696 = vmatprep.subr.msk.bf16.mxu0 %vm4224_vm4, %v3694_v22 }
0x1826   :  { %v3917_v26 = vpop.eup %3916 }
0x1827   :  { %v2193_v27 = vmul.f32 %v3917_v26, %v3913_v16 }
0x1829   :  { %3457 = vmatprep.mubr.msk.f32.mxu0 %vm408_vm5, %v2193_v27 }
0x182a   :  { %3458 = vmatmul.mubr.msk.f32.vlgmr.msra.gmra.mrb[14].mxu0 %vm408_vm5, %v2194_v29 }
0x182b   :  { %3699 = vmatpush3.bf16.xpose.msk.msra.mxu0 %vm4224_vm4, %v3694_v22  ;;  %3464 = vmatprep.mubr.msk.f32.mxu0 %vm324_vm3, %v2284_v31 }
0x1832   :  { %3465 = vmatmul.mubr.msk.f32.vlgmr.msra.gmra.mrb[16].mxu0 %vm324_vm3, %v2286_v33 }
0x18fd   :  { %v3459_v34 = vpop.f32.mrb[14].mxu0 }
0x18fe   :  { %v2274_v35 = vpop.f32.mrb[15].mxu0 }
0x1905   :  { %v3466_v36 = vpop.f32.mrb[16].mxu0 }
0x1906   :  { %v2371_v37 = vadd.f32 %v3942_v21, %v3466_v36  ;;  %v2365_v38 = vpop.f32.mrb[17].mxu0 }
0x1907   :  { %v2366_v24 = vadd.f32 %v3943_v6, %v2365_v38  ;;  %v3138_v6 = vld [vmem:[%s4740_s8 + $0x30] sm:$0xff]  ;;  %v3149_v38 = vld [vmem:[%s4742_s12 + $0x28] sm:$0xff] }
0x1908   :  { %v2377_v39 = vsel %vm412_vm6, %v2371_v37, -inf  ;;  %v3710_v8 = vpack.c.bf16 %v3139_v4, %v3138_v6  ;;  %v3161_v4 = vld [vmem:[%s4745_s14 + $0x68] sm:$0xff] }
0x1909   :  { %2378 = vmax.xlane.f32.xlu0 %v2377_v39  ;;  %v2374_v40 = vsel %vm408_vm5, %v2366_v24, -inf  ;;  %v3150_v39 = vld [vmem:[%s4742_s12 + $0x30] sm:$0xff] }
0x190a   :  { %2375 = vmax.xlane.f32.xlu1 %v2374_v40  ;;  %v3151_v40 = vld [vmem:[%s4742_s12 + $0x38] sm:$0xff] }
0x191b   :  { %3838 = vrot.lane.b32.xlu1 %v4486_v47, %s4791_s22 }
0x191f   :  { %2488 = vrot.lane.b32.xlu1 %v4552_v62, %s4792_s6 }
0x1923   :  { %2494 = vrot.lane.b32.xlu1 %v2274_v35, %s4793_s26 }
0x1927   :  { %2496 = vrot.lane.b32.xlu1 %v3459_v34, %s4793_s26 }
0x1996   :  { %v2379_v28 = vpop.xlane.xlu0 %2378 }
0x1997   :  { %v2381_v41 = vsub.f32 %v2371_v37, %v2379_v28  ;;  %v2376_v44 = vpop.xlane.xlu1 %2375  ;;  %v3148_v37 = vld [vmem:[%s4742_s12 + $0x20] sm:$0xff]  ;;  %v3718_v28 = vpack.c.bf16 %v3151_v40, %v3150_v39 }
0x1998   :  { %v2380_v49 = vsub.f32 %v2366_v24, %v2376_v44  ;;  %v3714_v24 = vpack.c.bf16 %v3149_v38, %v3148_v37 }
0x1999   :  { %v2384_v50 = vmul.f32 1.442695, %v2381_v41 }
0x199a   :  { %v2382_v51 = vmul.f32 1.442695, %v2380_v49  ;;  %3715 = vmatprep.subr.bf16.mxu0 %v3714_v24 }
0x199b   :  { %v3839_v52 = vpop.permute.xlu1 %3838  ;;  %3717 = vmatpush3.bf16.msra.mxu0 %v3714_v24 }
0x199c   :  { %3918 = vpow2.f32 %v2382_v51  ;;  %v3841_v45 = vunpack.i.h.bf16 %v3839_v52  ;;  %v3840_v53 = vunpack.i.l.bf16 %v3839_v52  ;;  %3719 = vmatprep.subr.bf16.mxu0 %v3718_v28 }
0x199d   :  { %3920 = vpow2.f32 %v2384_v50 }
0x199e   :  { %v3700_v54 = vpack.c.bf16 %v3841_v45, %v3840_v53  ;;  %v3146_v53 = vld [vmem:[%s4743_s10 + $0x1] ss:$0 sm:$0xff] }
0x199f   :  { %v2489_v12 = vpop.permute.xlu1 %2488  ;;  %3721 = vmatpush3.bf16.msra.mxu0 %v3718_v28 }
0x19a0   :  { %3702 = vmatprep.subr.msk.bf16.mxu1 %vm4252_vm9, %v3700_v54  ;;  %v2509_v30 = vsel %vm324_vm3, %v4548_v60, %v2489_v12 }
0x19a1   :  { %3705 = vmatpush3.bf16.msk.msra.mxu1 %vm4252_vm9, %v3700_v54 }
0x19a3   :  { %v2495_v9 = vpop.permute.xlu1 %2494 }
0x19a6   :  { %v3919_v47 = vpop.eup %3918 }
0x19a7   :  { %v2386_v55 = vsel %vm408_vm5, %v3919_v47, 0.0  ;;  %v3921_v56 = vpop.eup %3920  ;;  %v2497_v13 = vpop.permute.xlu1 %2496 }
0x19a8   :  { %2387 = vadd.xlane.f32.xlu0 %v2386_v55  ;;  %v2389_v57 = vsel %vm412_vm6, %v3921_v56, 0.0  ;;  %v2511_v42 = vsel %vm1150_vm10, %v2509_v30, %v2497_v13 }
0x19ac   :  { %2390 = vadd.xlane.f32.xlu0 %v2389_v57 }
0x19c2   :  { %2486 = vrot.lane.b32.xlu0 %v4554_v63, %s4792_s6  ;;  %v3137_v63 = vld [vmem:[%s4740_s8 + $0x28] sm:$0xff] }
0x19c3   :  { %v3706_v7 = vpack.c.bf16 %v3137_v63, %v3136_v1  ;;  %v3158_v1 = vld [vmem:[%s4745_s14 + $0x50] sm:$0xff]  ;;  %v3159_v63 = vld [vmem:[%s4745_s14 + $0x58] sm:$0xff] }
0x19c4   :  { %v3726_v6 = vpack.c.bf16 %v3159_v63, %v3158_v1 }
0x19c5   :  { %3707 = vmatprep.subr.bf16.mxu1 %v3706_v7 }
0x1a35   :  { %v2388_v59 = vpop.xlane.xlu0 %2387 }
0x1a36   :  { %3922 = vrcp.f32 %v2388_v59 }
0x1a39   :  { %v2391_v62 = vpop.xlane.xlu0 %2390 }
0x1a3a   :  { %3924 = vrcp.f32 %v2391_v62 }
0x1a3d   :  { %v2487_v10 = vpop.permute.xlu0 %2486 }
0x1a3e   :  { %v2508_v14 = vsel %vm324_vm3, %v4550_v61, %v2487_v10  ;;  %v3143_v61 = vld [vmem:[%s4741_s9 + $0x1] ss:$0 sm:$0xff] }
0x1a3f   :  { %v2510_v32 = vsel %vm1150_vm10, %v2508_v14, %v2495_v9  ;;  %v3153_v9 = vld [vmem:[%s4746_s13 + $0x1] ss:$0 sm:$0xff] }
0x1a40   :  { %v3923_v23 = vpop.eup %3922 }
0x1a41   :  { %v2394_v21 = vmul.f32 %v3923_v23, %v3919_v47  ;;  %v3147_v47 = vld [vmem:[%s4744_s11 + $0x1] ss:$0 sm:$0xff] }
0x1a43   :  { %3471 = vmatprep.mubr.msk.f32.mxu1 %vm408_vm5, %v2394_v21  ;;  %v3156_v21 = vld [vmem:[%s4745_s14 + $0x40] sm:$0xff] }
0x1a44   :  { %v3925_v58 = vpop.eup %3924 }
0x1a45   :  { %v2395_v0 = vmul.f32 %v3925_v58, %v3921_v56  ;;  %v3157_v58 = vld [vmem:[%s4745_s14 + $0x48] sm:$0xff] }
0x1a47   :  { %3472 = vmatmul.mubr.msk.f32.vlgmr.msra.gmra.mrb[26].mxu1 %vm408_vm5, %v2395_v0  ;;  %v3722_v0 = vpack.c.bf16 %v3157_v58, %v3156_v21 }
0x1a48   :  { %3709 = vmatpush3.bf16.msra.mxu1 %v3706_v7  ;;  %v3160_v7 = vld [vmem:[%s4745_s14 + $0x60] sm:$0xff] }
0x1a49   :  { %3711 = vmatprep.subr.bf16.mxu1 %v3710_v8 }
0x1a4c   :  { %3713 = vmatpush3.bf16.msra.mxu1 %v3710_v8  ;;  %v3730_v8 = vpack.c.bf16 %v3161_v4, %v3160_v7  ;;  %v3167_v7 = vld [vmem:[%s4747_s15 + $0x1] ss:$0 sm:$0xff] }
0x1a4d   :  { %3723 = vmatprep.subr.bf16.mxu1 %v3722_v0 }
0x1b1a   :  { %v3473_v3 = vpop.f32.mrb[26].mxu1 }
0x1b1b   :  { %2504 = vrot.lane.b32.xlu1 %v3473_v3, %s4794_s3  ;;  %v2475_v11 = vpop.f32.mrb[27].mxu1  ;;  %v3162_v3 = vld [vmem:[%s4745_s14 + $0x70] sm:$0xff] }
0x1b1c   :  { %2502 = vrot.lane.b32.xlu0 %v2475_v11, %s4794_s3  ;;  %v3163_v11 = vld [vmem:[%s4745_s14 + $0x78] sm:$0xff] }
0x1b1d   :  { %v3734_v12 = vpack.c.bf16 %v3163_v11, %v3162_v3 }
0x1b8d   :  { %v2505_v15 = vpop.permute.xlu1 %2504 }
0x1b8e   :  { %v2503_v46 = vpop.permute.xlu0 %2502  ;;  %v2513_v17 = vsel %vm1153_vm11, %v2511_v42, %v2505_v15 }
0x1b8f   :  { %v2512_v16 = vsel %vm1153_vm11, %v2510_v32, %v2503_v46 }
0x1b90   :  { %3482 = vmatprep.mubr.msk.f32.mxu1 %vm181_vm1, %v2512_v16 }
0x1b91   :  { %3483 = vmatmul.mubr.msk.f32.vlgmr.msra.gmra.mrb[28].mxu1 %vm181_vm1, %v2513_v17 }
0x1b92   :  { %3725 = vmatpush3.bf16.msra.mxu1 %v3722_v0 }
0x1b93   :  { %3727 = vmatprep.subr.bf16.mxu1 %v3726_v6 }
0x1b96   :  { %3729 = vmatpush3.bf16.msra.mxu1 %v3726_v6 }
0x1b97   :  { %3731 = vmatprep.subr.bf16.mxu1 %v3730_v8 }
0x1b9a   :  { %3733 = vmatpush3.bf16.msra.mxu1 %v3730_v8 }
0x1b9b   :  { %3735 = vmatprep.subr.bf16.mxu1 %v3734_v12 }
0x1b9e   :  { %3737 = vmatpush3.bf16.msra.mxu1 %v3734_v12 }
0x1c64   :  { %v3484_v18 = vpop.f32.mrb[28].mxu1 }
0x1c65   :  { %v2601_v60 = vadd.f32 %v3484_v18, %v4443_v2  ;;  %v2591_v48 = vpop.f32.mrb[29].mxu1 }
0x1c66   :  { %v2600_v43 = vadd.f32 %v2591_v48, %v4445_v5 }
0x1c67   :  { %v4633_v19 = vadd.f32 %v3143_v61, %v2601_v60 }
0x1c68   :  { %v4635_v20 = vadd.f32 %v3143_v61, %v2600_v43 }
0x1c69   :  { %v2619_v22 = vsel %vm185_vm2, %v4633_v19, 0.0 }
0x1c6a   :  { %2620 = vadd.xlane.f32.xlu1 %v2619_v22  ;;  %v2616_v25 = vsel %vm181_vm1, %v4635_v20, 0.0 }
0x1c6b   :  { %2617 = vadd.xlane.f32.xlu0 %v2616_v25 }
0x1cf7   :  { %v2621_v26 = vpop.xlane.xlu1 %2620 }
0x1cf8   :  { %v2623_v27 = vmul.f32 0.03125, %v2621_v26  ;;  %v2618_v29 = vpop.xlane.xlu0 %2617 }
0x1cf9   :  { %v2622_v31 = vmul.f32 0.03125, %v2618_v29 }
0x1cfa   :  { %v2625_v2 = vsub.f32 %v4633_v19, %v2623_v27 }
0x1cfb   :  { %v2624_v5 = vsub.f32 %v4635_v20, %v2622_v31 }
0x1cfc   :  { %v2627_v35 = vmul.f32 %v2625_v2, %v2625_v2 }
0x1cfd   :  { %v2626_v33 = vmul.f32 %v2624_v5, %v2624_v5 }
0x1cfe   :  { %v2631_v36 = vsel %vm185_vm2, %v2627_v35, 0.0 }
0x1cff   :  { %v2628_v34 = vsel %vm181_vm1, %v2626_v33, 0.0 }
0x1d00   :  { %2629 = vadd.xlane.f32.xlu0 %v2628_v34 }
0x1d04   :  { %2632 = vadd.xlane.f32.xlu0 %v2631_v36 }
0x1d8d   :  { %v2630_v41 = vpop.xlane.xlu0 %2629 }
0x1d8e   :  { %v2634_v44 = vmul.f32 0.03125, %v2630_v41 }
0x1d90   :  { %v2636_v49 = vadd.f32 1e-06, %v2634_v44 }
0x1d91   :  { %v2633_v50 = vpop.xlane.xlu0 %2632 }
0x1d92   :  { %3926 = vrsqrt.f32 %v2636_v49  ;;  %v2635_v51 = vmul.f32 0.03125, %v2633_v50 }
0x1d94   :  { %v2637_v52 = vadd.f32 1e-06, %v2635_v51 }
0x1d96   :  { %3928 = vrsqrt.f32 %v2637_v52 }
0x1d9c   :  { %v3927_v45 = vpop.eup %3926 }
0x1d9d   :  { %v2640_v54 = vmul.f32 %v3927_v45, %v2624_v5 }
0x1d9f   :  { %v2648_v55 = vmul.f32 %v3146_v53, %v2640_v54 }
0x1da0   :  { %v3929_v56 = vpop.eup %3928 }
0x1da1   :  { %v2641_v57 = vmul.f32 %v3929_v56, %v2625_v2  ;;  %v2656_v59 = vadd.f32 %v3147_v47, %v2648_v55 }
0x1da3   :  { %v2649_v62 = vmul.f32 %v3146_v53, %v2641_v57  ;;  %3493 = vmatprep.mubr.msk.f32.mxu0 %vm181_vm1, %v2656_v59 }
0x1da5   :  { %v2657_v23 = vadd.f32 %v3147_v47, %v2649_v62 }
0x1da7   :  { %3494 = vmatmul.mubr.msk.f32.vlgmr.msra.gmra.mrb[18].mxu0 %vm181_vm1, %v2657_v23 }
0x1e7a   :  { %v3495_v10 = vpop.f32.mrb[18].mxu0 }
0x1e7b   :  { %v2749_v13 = vadd.f32 %v3495_v10, %v3153_v9  ;;  %v2743_v14 = vpop.f32.mrb[19].mxu0 }
0x1e7c   :  { %v2744_v15 = vadd.f32 %v3153_v9, %v2743_v14 }
0x1e7d   :  { %v2755_v30 = vmul.f32 0.70710677, %v2749_v13  ;;  %v2753_v0 = vmul.f32 0.5, %v2749_v13 }
0x1e7e   :  { %v2754_v32 = vmul.f32 0.70710677, %v2744_v15  ;;  %v2752_v21 = vmul.f32 0.5, %v2744_v15 }
0x1e7f   :  { %v2757_v46 = vand.u32 2147483647, %v2755_v30  ;;  %vm2797_vm14 = vcmp.lt.f32.partialorder %v2755_v30, 0.0 }
0x1e80   :  { %v2756_v42 = vand.u32 2147483647, %v2754_v32  ;;  %vm2796_vm15 = vcmp.lt.f32.partialorder %v2754_v32, 0.0 }
0x1e81   :  { %v2759_v16 = vmul.f32 0.3275911, %v2757_v46  ;;  %v2785_v60 = vsub.f32 0.0, %v2757_v46 }
0x1e82   :  { %v2758_v17 = vmul.f32 0.3275911, %v2756_v42  ;;  %v2784_v48 = vsub.f32 0.0, %v2756_v42 }
0x1e83   :  { %v2761_v18 = vadd.f32 1.0, %v2759_v16  ;;  %v2787_v22 = vmul.f32 %v2785_v60, %v2757_v46  ;;  %v2954_v60 = vld [vmem:[%s4748_s18 + $0x10] sm:$0xff] }
0x1e84   :  { %v2760_v61 = vadd.f32 1.0, %v2758_v17  ;;  %v2786_v27 = vmul.f32 %v2784_v48, %v2756_v42  ;;  %v2952_v17 = vld [vmem:[%s4748_s18] sm:$0xff]  ;;  %v2955_v48 = vld [vmem:[%s4748_s18 + $0x18] sm:$0xff] }
0x1e85   :  { %3930 = vrcp.f32 %v2761_v18  ;;  %v2790_v2 = vmul.f32 1.442695, %v2787_v22  ;;  %v2953_v18 = vld [vmem:[%s4748_s18 + $0x8] sm:$0xff] }
0x1e86   :  { %3932 = vrcp.f32 %v2760_v61  ;;  %v2788_v34 = vmul.f32 1.442695, %v2786_v27  ;;  %v3738_v61 = vpack.c.bf16 %v2953_v18, %v2952_v17 }
0x1e87   :  { %3934 = vpow2.f32 %v2790_v2 }
0x1e88   :  { %3936 = vpow2.f32 %v2788_v34  ;;  %3739 = vmatprep.subr.bf16.mxu0 %v3738_v61 }
0x1e89   :  { %3741 = vmatpush3.bf16.msra.mxu0 %v3738_v61 }
0x1e8f   :  { %v3931_v43 = vpop.eup %3930 }
0x1e90   :  { %v3933_v25 = vpop.eup %3932  ;;  %v2767_v26 = vmul.f32 1.0614054, %v3931_v43 }
0x1e91   :  { %v2766_v29 = vmul.f32 1.0614054, %v3933_v25  ;;  %v3935_v51 = vpop.eup %3934 }
0x1e92   :  { %v2769_v31 = vadd.f32 -1.4531521, %v2767_v26  ;;  %v3937_v45 = vpop.eup %3936 }
0x1e93   :  { %v2768_v5 = vadd.f32 -1.4531521, %v2766_v29 }
0x1e94   :  { %v2771_v33 = vmul.f32 %v3931_v43, %v2769_v31 }
0x1e95   :  { %v2770_v35 = vmul.f32 %v3933_v25, %v2768_v5  ;;  %v3168_v5 = vld [vmem:[%s4749_s16] ss:$0 sm:$0xff] }
0x1e96   :  { %v2773_v36 = vadd.f32 1.4214138, %v2771_v33 }
0x1e97   :  { %v2772_v37 = vadd.f32 1.4214138, %v2770_v35 }
0x1e98   :  { %v2775_v38 = vmul.f32 %v3931_v43, %v2773_v36  ;;  %v3169_v36 = vld [vmem:[%s4750_s17] ss:$0 sm:$0xff] }
0x1e99   :  { %v2774_v24 = vmul.f32 %v3933_v25, %v2772_v37 }
0x1e9a   :  { %v2777_v39 = vadd.f32 -0.28449672, %v2775_v38 }
0x1e9b   :  { %v2776_v40 = vadd.f32 -0.28449672, %v2774_v24 }
0x1e9c   :  { %v2779_v28 = vmul.f32 %v3931_v43, %v2777_v39 }
0x1e9d   :  { %v2778_v41 = vmul.f32 %v3933_v25, %v2776_v40  ;;  %v3170_v40 = vld [vmem:[%s4751_s19] ss:$0 sm:$0xff] }
0x1e9e   :  { %v2781_v44 = vadd.f32 0.2548296, %v2779_v28 }
0x1e9f   :  { %v2780_v49 = vadd.f32 0.2548296, %v2778_v41 }
0x1ea0   :  { %v2783_v50 = vmul.f32 %v3931_v43, %v2781_v44  ;;  %v3742_v43 = vpack.c.bf16 %v2955_v48, %v2954_v60 }
0x1ea1   :  { %v2782_v52 = vmul.f32 %v3933_v25, %v2780_v49 }
0x1ea2   :  { %v2793_v53 = vmul.f32 %v3935_v51, %v2783_v50  ;;  %3743 = vmatprep.subr.bf16.mxu0 %v3742_v43 }
0x1ea3   :  { %v2792_v54 = vmul.f32 %v3937_v45, %v2782_v52  ;;  %3745 = vmatpush3.bf16.msra.mxu0 %v3742_v43 }
0x1ea4   :  { %v2795_v47 = vsub.f32 1.0, %v2793_v53 }
0x1ea5   :  { %v2794_v55 = vsub.f32 1.0, %v2792_v54 }
0x1ea6   :  { %v2799_v56 = vsub.f32 0.0, %v2795_v47 }
0x1ea7   :  { %v2798_v57 = vsub.f32 0.0, %v2794_v55 }
0x1ea8   :  { %v2801_v59 = vsel %vm2797_vm14, %v2799_v56, %v2795_v47 }
0x1ea9   :  { %v2803_v62 = vadd.f32 1.0, %v2801_v59  ;;  %v2800_v23 = vsel %vm2796_vm15, %v2798_v57, %v2794_v55 }
0x1eaa   :  { %v2802_v58 = vadd.f32 1.0, %v2800_v23 }
0x1eab   :  { %v2805_v63 = vmul.f32 %v2803_v62, %v2753_v0 }
0x1eac   :  { %v2804_v1 = vmul.f32 %v2802_v58, %v2752_v21 }
0x1eae   :  { %3512 = vmatprep.mubr.msk.f32.mxu1 %vm95_vm0, %v2804_v1 }
0x1eaf   :  { %3513 = vmatmul.mubr.msk.f32.vlgmr.msra.gmra.mrb[30].mxu1 %vm95_vm0, %v2805_v63 }
0x1f82   :  { %v3514_v6 = vpop.f32.mrb[30].mxu1 }
0x1f83   :  { %v2897_v4 = vadd.f32 %v3514_v6, %v4633_v19  ;;  %v2887_v8 = vpop.f32.mrb[31].mxu1 }
0x1f84   :  { %v2896_v3 = vadd.f32 %v2887_v8, %v4635_v20 }
0x1f85   :  { %v2907_v11 = vadd.f32 %v3167_v7, %v2897_v4 }
0x1f86   :  { %v2906_v12 = vadd.f32 %v3167_v7, %v2896_v3 }
0x1f87   :  { %v2913_v9 = vsel %vm185_vm2, %v2907_v11, 0.0 }
0x1f88   :  { %2914 = vadd.xlane.f32.xlu1 %v2913_v9  ;;  %v2910_v10 = vsel %vm181_vm1, %v2906_v12, 0.0 }
0x1f89   :  { %2911 = vadd.xlane.f32.xlu0 %v2910_v10 }
0x2015   :  { %v2915_v13 = vpop.xlane.xlu1 %2914 }
0x2016   :  { %v2917_v14 = vmul.f32 0.03125, %v2915_v13  ;;  %v2912_v15 = vpop.xlane.xlu0 %2911 }
0x2017   :  { %v2916_v30 = vmul.f32 0.03125, %v2912_v15 }
0x2018   :  { %v2919_v32 = vsub.f32 %v2907_v11, %v2917_v14 }
0x2019   :  { %v2918_v46 = vsub.f32 %v2906_v12, %v2916_v30 }
0x201a   :  { %v2921_v42 = vmul.f32 %v2919_v32, %v2919_v32 }
0x201b   :  { %v2920_v16 = vmul.f32 %v2918_v46, %v2918_v46 }
0x201c   :  { %v2925_v19 = vsel %vm185_vm2, %v2921_v42, 0.0 }
0x201d   :  { %2926 = vadd.xlane.f32.xlu1 %v2925_v19  ;;  %v2922_v20 = vsel %vm181_vm1, %v2920_v16, 0.0 }
0x201e   :  { %2923 = vadd.xlane.f32.xlu0 %v2922_v20 }
0x20aa   :  { %v2927_v22 = vpop.xlane.xlu1 %2926 }
0x20ab   :  { %v2929_v25 = vmul.f32 0.03125, %v2927_v22  ;;  %v2924_v26 = vpop.xlane.xlu0 %2923 }
0x20ac   :  { %v2928_v27 = vmul.f32 0.03125, %v2924_v26 }
0x20ad   :  { %v2931_v29 = vadd.f32 1e-06, %v2929_v25 }
0x20ae   :  { %v2930_v31 = vadd.f32 1e-06, %v2928_v27 }
0x20af   :  { %3938 = vrsqrt.f32 %v2931_v29 }
0x20b0   :  { %3940 = vrsqrt.f32 %v2930_v31 }
0x20b9   :  { %v3939_v2 = vpop.eup %3938 }
0x20ba   :  { %v3941_v33 = vpop.eup %3940  ;;  %v2935_v34 = vmul.f32 %v3939_v2, %v2919_v32 }
0x20bb   :  { %v2934_v35 = vmul.f32 %v3941_v33, %v2918_v46 }
0x20bc   :  { %v2943_v37 = vmul.f32 %v3168_v5, %v2935_v34 }
0x20bd   :  { %v2942_v38 = vmul.f32 %v3168_v5, %v2934_v35 }
0x20be   :  { %v2951_v39 = vadd.f32 %v3169_v36, %v2943_v37 }
0x20bf   :  { %v2950_v24 = vadd.f32 %v3169_v36, %v2942_v38 }
0x20c1   :  { %3523 = vmatprep.mubr.msk.f32.mxu0 %vm181_vm1, %v2950_v24 }
0x20c2   :  { %3524 = vmatmul.mubr.msk.f32.vlgmr.msra.gmra.mrb[20].mxu0 %vm181_vm1, %v2951_v39 }
0x2195   :  { %v3525_v28 = vpop.f32.mrb[20].mxu0 }
0x2196   :  { %v3041_v41 = vadd.f32 %v3525_v28, %v3170_v40  ;;  %v3035_v44 = vpop.f32.mrb[21].mxu0 }
0x2197   :  { %v3036_v49 = vadd.f32 %v3170_v40, %v3035_v44 }
0x2198   :  { %3045 = vst [vmem:[%s4752_s20 + $0x8] sm:$0x3] %v3041_v41 }
0x2199   :  { %3044 = vst [vmem:[%s4752_s20] sm:$0xff] %v3036_v49 }

</bundles_post_ra>
